<compile_context>
chip_gen: v7x
topology: tpu7x:2x2x1
jax: 0.10.0
libtpu: 0.0.40
codegen_flags: <defaults>
</compile_context>

<pallas_src>
import functools

import jax
import jax.numpy as jnp
from jax.experimental import pallas as pl
from jax.experimental.pallas import tpu as pltpu


# ----------------------------------------------------------------------------
# helpers
# ----------------------------------------------------------------------------
def _round_up(x, m):
    return ((x + m - 1) // m) * m


@functools.lru_cache(maxsize=None)
def _vmem_limit_bytes():
    """Raise the scoped-VMEM limit with headroom, but never above half physical."""
    try:
        cap = pltpu.get_tpu_info().vmem_capacity_bytes
        return int(min(64 * 1024 * 1024, cap // 2))
    except Exception:
        return None


def _compiler_params(dimension_semantics):
    kw = dict(dimension_semantics=dimension_semantics)
    limit = _vmem_limit_bytes()
    if limit is not None:
        kw["vmem_limit_bytes"] = limit
    return pltpu.CompilerParams(**kw)


# ----------------------------------------------------------------------------
# Pallas kernels
# ----------------------------------------------------------------------------
def _gemm_bias_act_kernel(p_ref, w_ref, b_ref, o_ref, acc_ref, *,
                          negative_slope, apply_act):
    """One (M,N) tile of out = LeakyReLU(patches @ w + b); K is a grid axis."""
    @pl.when(pl.program_id(2) == 0)
    def _():
        acc_ref[...] = jnp.zeros_like(acc_ref)

    # bf16 x bf16 -> f32 accumulate on the MXU.
    acc_ref[...] += jnp.dot(p_ref[...], w_ref[...],
                            preferred_element_type=jnp.float32)

    @pl.when(pl.program_id(2) == pl.num_programs(2) - 1)
    def _():
        acc = acc_ref[...] + b_ref[...]          # (1, TN) broadcasts over TM
        if apply_act:
            # LeakyReLU in f32 before the (possibly bf16) downcast store.
            acc = jnp.where(acc >= 0.0, acc, acc * negative_slope)
        o_ref[...] = acc.astype(o_ref.dtype)


def _bce_sum_kernel(x_ref, o_ref, *, target, count):
    """Row-tiled mean BCE-with-logits against a constant label (0.0 / 1.0)."""
    i = pl.program_id(0)

    @pl.when(i == 0)
    def _():
        o_ref[...] = jnp.zeros_like(o_ref)

    x = x_ref[...]
    rows, lanes = x.shape
    r = jax.lax.broadcasted_iota(jnp.int32, x.shape, 0)
    c = jax.lax.broadcasted_iota(jnp.int32, x.shape, 1)
    gidx = (i * rows + r) * lanes + c            # global flat index
    loss = jnp.maximum(x, 0.0) - x * target + jnp.log1p(jnp.exp(-jnp.abs(x)))
    loss = jnp.where(gidx < count, loss, 0.0)    # mask zero-padding exactly
    o_ref[...] += jnp.sum(loss).reshape(1, 1)

    @pl.when(i == pl.num_programs(0) - 1)
    def _():
        o_ref[...] = o_ref[...] / count


def _l1_sum_kernel(a_ref, b_ref, o_ref, *, count):
    i = pl.program_id(0)

    @pl.when(i == 0)
    def _():
        o_ref[...] = jnp.zeros_like(o_ref)

    # both tensors zero-padded identically -> padded diff is exactly 0
    o_ref[...] += jnp.sum(jnp.abs(a_ref[...] - b_ref[...])).reshape(1, 1)

    @pl.when(i == pl.num_programs(0) - 1)
    def _():
        o_ref[...] = o_ref[...] / count


# ----------------------------------------------------------------------------
# Pallas wrappers
# ----------------------------------------------------------------------------
def gemm_bias_act(patches, w_mat, bias, *, negative_slope, apply_act, out_dtype):
    M, K = patches.shape
    _, Cout = w_mat.shape

    # --- tiling (lane-dense N, aligned K, large M tiles) ---------------------
    TM = min(512, _round_up(M, 256))
    Mp = _round_up(M, TM)
    Kp = _round_up(K, 128)
    if Kp > 1024:
        TK = 512
        Kp = _round_up(Kp, TK)
    else:
        TK = Kp
    TN = 128
    Np = _round_up(Cout, TN)

    # bf16 operands for the MXU; zero padding is exact for the matmul.
    patches_p = jnp.pad(patches.astype(jnp.bfloat16), ((0, Mp - M), (0, Kp - K)))
    w_p = jnp.pad(w_mat.astype(jnp.bfloat16), ((0, Kp - K), (0, Np - Cout)))
    b_p = jnp.pad(bias.astype(jnp.float32).reshape(1, Cout),
                  ((0, 0), (0, Np - Cout)))

    out = pl.pallas_call(
        functools.partial(_gemm_bias_act_kernel,
                          negative_slope=negative_slope, apply_act=apply_act),
        out_shape=jax.ShapeDtypeStruct((Mp, Np), out_dtype),
        grid=(Mp // TM, Np // TN, Kp // TK),
        in_specs=[
            pl.BlockSpec((TM, TK), lambda i, j, k: (i, k)),
            pl.BlockSpec((TK, TN), lambda i, j, k: (k, j)),
            pl.BlockSpec((1, TN), lambda i, j, k: (0, j)),
        ],
        out_specs=pl.BlockSpec((TM, TN), lambda i, j, k: (i, j)),
        scratch_shapes=[pltpu.VMEM((TM, TN), jnp.float32)],
        compiler_params=_compiler_params(("parallel", "parallel", "arbitrary")),
    )(patches_p, w_p, b_p)
    return out[:M, :Cout]


_LANES = 128


def _to_row_tiles(x_flat):
    """Flatten -> zero-padded (rows_p, 128) f32 layout for the reduction kernels."""
    n = x_flat.size
    rows = max(1, -(-n // _LANES))
    tile_rows = min(256, _round_up(rows, 8))
    rows_p = _round_up(rows, tile_rows)
    total = rows_p * _LANES
    xp = jnp.pad(x_flat.astype(jnp.float32), (0, total - n)).reshape(rows_p, _LANES)
    return xp, n, tile_rows, rows_p


def bce_with_logits_const(logits, target):
    xp, n, tile_rows, rows_p = _to_row_tiles(logits.reshape(-1))
    out = pl.pallas_call(
        functools.partial(_bce_sum_kernel, target=float(target), count=n),
        out_shape=jax.ShapeDtypeStruct((1, 1), jnp.float32),
        grid=(rows_p // tile_rows,),
        in_specs=[pl.BlockSpec((tile_rows, _LANES), lambda i: (i, 0))],
        out_specs=pl.BlockSpec((1, 1), lambda i: (0, 0)),
        compiler_params=_compiler_params(("arbitrary",)),
    )(xp)
    return out[0, 0]


def l1_mean(a, b):
    ap, n, tile_rows, rows_p = _to_row_tiles(a.reshape(-1))
    bp, _, _, _ = _to_row_tiles(b.reshape(-1))
    out = pl.pallas_call(
        functools.partial(_l1_sum_kernel, count=n),
        out_shape=jax.ShapeDtypeStruct((1, 1), jnp.float32),
        grid=(rows_p // tile_rows,),
        in_specs=[pl.BlockSpec((tile_rows, _LANES), lambda i: (i, 0)),
                  pl.BlockSpec((tile_rows, _LANES), lambda i: (i, 0))],
        out_specs=pl.BlockSpec((1, 1), lambda i: (0, 0)),
        compiler_params=_compiler_params(("arbitrary",)),
    )(ap, bp)
    return out[0, 0]


# ----------------------------------------------------------------------------
# Conv via im2col (bf16 glue) + Pallas GEMM (hot path)
# ----------------------------------------------------------------------------
def conv2d_lrelu(x_nhwc, w_oihw, bias, *, stride, pad, negative_slope,
                 apply_act, out_dtype):
    N, H, W, _ = x_nhwc.shape
    Cout, Cin, KH, KW = w_oihw.shape
    xp = jnp.pad(x_nhwc, ((0, 0), (pad, pad), (pad, pad), (0, 0)))
    OH = (H + 2 * pad - KH) // stride + 1
    OW = (W + 2 * pad - KW) // stride + 1
    cols = []
    for i in range(KH):
        for j in range(KW):
            cols.append(xp[:, i:i + stride * OH:stride, j:j + stride * OW:stride, :])
    patches = jnp.stack(cols, axis=3).reshape(N * OH * OW, KH * KW * Cin)
    # weight reordered to match the patch flattening order (kh, kw, cin) -> cout
    w_mat = jnp.transpose(w_oihw, (2, 3, 1, 0)).reshape(KH * KW * Cin, Cout)
    out = gemm_bias_act(patches, w_mat, bias, negative_slope=negative_slope,
                        apply_act=apply_act, out_dtype=out_dtype)
    return out.reshape(N, OH, OW, Cout)


# ----------------------------------------------------------------------------
# PatchGAN discriminator (standard pix2pix structure, norm layers omitted)
# ----------------------------------------------------------------------------
def patchgan_forward(params, x_nchw):
    # NCHW -> NHWC, bf16 activations throughout the conv stack.
    x = jnp.transpose(x_nchw, (0, 2, 3, 1)).astype(jnp.bfloat16)
    for (w, b) in params["down"]:
        x = conv2d_lrelu(x, w, b, stride=2, pad=1, negative_slope=0.2,
                         apply_act=True, out_dtype=jnp.bfloat16)
    w, b = params["final"]
    x = conv2d_lrelu(x, w, b, stride=1, pad=1, negative_slope=0.2,
                     apply_act=False, out_dtype=jnp.float32)
    return jnp.transpose(x, (0, 3, 1, 2))  # back to NCHW logits (f32)


def init_patchgan_params(key, n_layers, in_ch, ndf):
    """pix2pix init: conv weights ~ N(0, 0.02), biases zero."""
    params = {"down": [], "final": None}
    c_in = in_ch
    for i in range(n_layers):
        c_out = ndf * (2 ** i)
        key, k1 = jax.random.split(key)
        w = jax.random.normal(k1, (c_out, c_in, 4, 4), jnp.float32) * 0.02
        params["down"].append((w, jnp.zeros((c_out,), jnp.float32)))
        c_in = c_out
    key, k1 = jax.random.split(key)
    w = jax.random.normal(k1, (1, c_in, 4, 4), jnp.float32) * 0.02
    params["final"] = (w, jnp.zeros((1,), jnp.float32))
    return params


# ----------------------------------------------------------------------------
# Pix2Pix forward (mirrors the PyTorch module's forward)
# ----------------------------------------------------------------------------
def pix2pix_forward(disc_params, L, generated_img, true_output, *,
                    G_step, l1_scale_coeff=100.0):
    full_generated_img = jnp.concatenate([L, generated_img], axis=1)
    if not G_step:
        # .detach() only affects gradients; forward values are identical.
        # Fuse the fake/real discriminator passes into a single batched pass.
        true_img = jnp.concatenate([L, true_output], axis=1)
        both = jnp.concatenate([full_generated_img, true_img], axis=0)
        d_both = patchgan_forward(disc_params, both)
        B = L.shape[0]
        d_gen, d_true = d_both[:B], d_both[B:]
        desc_ce_generated = bce_with_logits_const(d_gen, 0.0)   # fake label
        desc_ce_true = bce_with_logits_const(d_true, 1.0)       # real label
        desc_loss = (desc_ce_generated + desc_ce_true) / 2.0
        return (desc_loss, desc_ce_generated, desc_ce_true)
    else:
        d_gen = patchgan_forward(disc_params, full_generated_img)
        generator_ce_loss = bce_with_logits_const(d_gen, 1.0)   # fool D -> real label
        generator_l1_loss = l1_mean(generated_img, true_output)
        generator_loss = generator_ce_loss + generator_l1_loss * l1_scale_coeff
        return [generator_loss, generator_ce_loss, generator_l1_loss]


# ----------------------------------------------------------------------------
if __name__ == "__main__":
    key = jax.random.PRNGKey(0)
    kL, kG, kT, kP = jax.random.split(key, 4)

    # small shapes: batch=2, L channels=1, image channels=2, spatial=16
    B, C_L, C_img, H, W = 2, 1, 2, 16, 16
    L = jax.random.normal(kL, (B, C_L, H, W), jnp.float32)
    generated_img = jax.random.normal(kG, (B, C_img, H, W), jnp.float32)
    true_output = jax.random.normal(kT, (B, C_img, H, W), jnp.float32)

    # descriminator_n_layers=2, in_channels + out_channels = 3, start_num_filters=8
    disc_params = init_patchgan_params(kP, n_layers=2, in_ch=C_L + C_img, ndf=8)

    d_step = jax.jit(functools.partial(pix2pix_forward, G_step=False))
    g_step = jax.jit(functools.partial(pix2pix_forward, G_step=True))

    d_losses = d_step(disc_params, L, generated_img, true_output)
    g_losses = g_step(disc_params, L, generated_img, true_output)

    jax.block_until_ready((d_losses, g_losses))
    print("KERNEL_OK")
</pallas_src>

<mosaic_0001>
module attributes {stable_mosaic.version = 11 : i64} {
  func.func @_gemm_bias_act_kernel(%arg0: i32, %arg1: i32, %arg2: i32, %arg3: memref<256x128xbf16, #tpu.memory_space<vmem>>, %arg4: memref<128x128xbf16, #tpu.memory_space<vmem>>, %arg5: memref<1x128xf32, #tpu.memory_space<vmem>>, %arg6: memref<256x128xbf16, #tpu.memory_space<vmem>>, %arg7: memref<256x128xf32, #tpu.memory_space<vmem>>) attributes {dimension_semantics = [#tpu.dimension_semantics<parallel>, #tpu.dimension_semantics<parallel>, #tpu.dimension_semantics<arbitrary>], iteration_bounds = array<i64: 1, 1, 1>, scalar_prefetch = 0 : i64, scratch_operands = 1 : i64, tpu.core_type = #tpu.core_type<tc>, window_params = [{transform_indices = @transform_0, window_bounds = array<i64: 256, 128>}, {transform_indices = @transform_1, window_bounds = array<i64: 128, 128>}, {transform_indices = @transform_2, window_bounds = array<i64: 1, 128>}, {transform_indices = @transform_3, window_bounds = array<i64: 256, 128>}]} {
    %c0_i32 = arith.constant 0 : i32
    %0 = arith.cmpi eq, %arg2, %c0_i32 : i32
    %1 = arith.extui %0 : i1 to i32
    %c0_i32_0 = arith.constant 0 : i32
    %2 = arith.cmpi ne, %1, %c0_i32_0 : i32
    scf.if %2 {
      %cst_10 = arith.constant 0.000000e+00 : f32
      %12 = vector.broadcast %cst_10 : f32 to vector<256x128xf32>
      %c0_11 = arith.constant 0 : index
      %c0_12 = arith.constant 0 : index
      %13 = vector.load %arg7[%c0_11, %c0_12] : memref<256x128xf32, #tpu.memory_space<vmem>>, vector<256x128xf32>
      tpu.vector_store %arg7[%c0_11, %c0_12], %12 {strides = array<i32>} : memref<256x128xf32, #tpu.memory_space<vmem>>, vector<256x128xf32>,
    } else {
    }
    %c0 = arith.constant 0 : index
    %c0_1 = arith.constant 0 : index
    %3 = vector.load %arg7[%c0, %c0_1] : memref<256x128xf32, #tpu.memory_space<vmem>>, vector<256x128xf32>
    %c0_2 = arith.constant 0 : index
    %c0_3 = arith.constant 0 : index
    %4 = vector.load %arg3[%c0_2, %c0_3] : memref<256x128xbf16, #tpu.memory_space<vmem>>, vector<256x128xbf16>
    %c0_4 = arith.constant 0 : index
    %c0_5 = arith.constant 0 : index
    %5 = vector.load %arg4[%c0_4, %c0_5] : memref<128x128xbf16, #tpu.memory_space<vmem>>, vector<128x128xbf16>
    %cst = arith.constant dense<0.000000e+00> : vector<256x128xf32>
    %6 = tpu.matmul %4, %5, %cst {dimension_numbers = #tpu.dot_dimension_numbers<[1], [0], [0], [1], [0, 0, 1, 1], [], []>} : vector<256x128xbf16>, vector<128x128xbf16>, vector<256x128xf32> -> vector<256x128xf32>
    %7 = arith.addf %3, %6 : vector<256x128xf32>
    %c0_6 = arith.constant 0 : index
    %c0_7 = arith.constant 0 : index
    %8 = vector.load %arg7[%c0_6, %c0_7] : memref<256x128xf32, #tpu.memory_space<vmem>>, vector<256x128xf32>
    tpu.vector_store %arg7[%c0_6, %c0_7], %7 {strides = array<i32>} : memref<256x128xf32, #tpu.memory_space<vmem>>, vector<256x128xf32>,
    %c0_i32_8 = arith.constant 0 : i32
    %9 = arith.cmpi eq, %arg2, %c0_i32_8 : i32
    %10 = arith.extui %9 : i1 to i32
    %c0_i32_9 = arith.constant 0 : i32
    %11 = arith.cmpi ne, %10, %c0_i32_9 : i32
    scf.if %11 {
      %c0_10 = arith.constant 0 : index
      %c0_11 = arith.constant 0 : index
      %12 = vector.load %arg7[%c0_10, %c0_11] : memref<256x128xf32, #tpu.memory_space<vmem>>, vector<256x128xf32>
      %c0_12 = arith.constant 0 : index
      %c0_13 = arith.constant 0 : index
      %13 = vector.load %arg5[%c0_12, %c0_13] : memref<1x128xf32, #tpu.memory_space<vmem>>, vector<1x128xf32>
      %14 = vector.broadcast %13 : vector<1x128xf32> to vector<256x128xf32>
      %15 = arith.addf %12, %14 : vector<256x128xf32>
      %cst_14 = arith.constant 0.000000e+00 : f32
      %16 = vector.broadcast %cst_14 : f32 to vector<256x128xf32>
      %17 = arith.cmpf oge, %15, %16 : vector<256x128xf32>
      %cst_15 = arith.constant 2.000000e-01 : f32
      %18 = vector.broadcast %cst_15 : f32 to vector<256x128xf32>
      %19 = arith.mulf %15, %18 : vector<256x128xf32>
      %20 = arith.select %17, %15, %19 : vector<256x128xi1>, vector<256x128xf32>
      %21 = arith.truncf %20 : vector<256x128xf32> to vector<256x128xbf16>
      %c0_16 = arith.constant 0 : index
      %c0_17 = arith.constant 0 : index
      %22 = vector.load %arg6[%c0_16, %c0_17] : memref<256x128xbf16, #tpu.memory_space<vmem>>, vector<256x128xbf16>
      tpu.vector_store %arg6[%c0_16, %c0_17], %21 {strides = array<i32>} : memref<256x128xbf16, #tpu.memory_space<vmem>>, vector<256x128xbf16>,
    } else {
    }
    return
  }
  func.func @transform_0(%arg0: i32, %arg1: i32, %arg2: i32) -> (i32, i32) {
    %c0_i32 = arith.constant 0 : i32
    return %arg0, %arg2 : i32, i32
  }
  func.func @transform_1(%arg0: i32, %arg1: i32, %arg2: i32) -> (i32, i32) {
    %c0_i32 = arith.constant 0 : i32
    return %arg2, %arg1 : i32, i32
  }
  func.func @transform_2(%arg0: i32, %arg1: i32, %arg2: i32) -> (i32, i32) {
    %c0_i32 = arith.constant 0 : i32
    %c0_i32_0 = arith.constant 0 : i32
    return %c0_i32, %arg1 : i32, i32
  }
  func.func @transform_3(%arg0: i32, %arg1: i32, %arg2: i32) -> (i32, i32) {
    %c0_i32 = arith.constant 0 : i32
    return %arg0, %arg1 : i32, i32
  }
}

module attributes {stable_mosaic.version = 11 : i64} {
  func.func @_gemm_bias_act_kernel(%arg0: i32, %arg1: i32, %arg2: i32, %arg3: memref<256x256xbf16, #tpu.memory_space<vmem>>, %arg4: memref<256x128xbf16, #tpu.memory_space<vmem>>, %arg5: memref<1x128xf32, #tpu.memory_space<vmem>>, %arg6: memref<256x128xf32, #tpu.memory_space<vmem>>, %arg7: memref<256x128xf32, #tpu.memory_space<vmem>>) attributes {dimension_semantics = [#tpu.dimension_semantics<parallel>, #tpu.dimension_semantics<parallel>, #tpu.dimension_semantics<arbitrary>], iteration_bounds = array<i64: 1, 1, 1>, scalar_prefetch = 0 : i64, scratch_operands = 1 : i64, tpu.core_type = #tpu.core_type<tc>, window_params = [{transform_indices = @transform_0, window_bounds = array<i64: 256, 256>}, {transform_indices = @transform_1, window_bounds = array<i64: 256, 128>}, {transform_indices = @transform_2, window_bounds = array<i64: 1, 128>}, {transform_indices = @transform_3, window_bounds = array<i64: 256, 128>}]} {
    %c0_i32 = arith.constant 0 : i32
    %0 = arith.cmpi eq, %arg2, %c0_i32 : i32
    %1 = arith.extui %0 : i1 to i32
    %c0_i32_0 = arith.constant 0 : i32
    %2 = arith.cmpi ne, %1, %c0_i32_0 : i32
    scf.if %2 {
      %cst_10 = arith.constant 0.000000e+00 : f32
      %12 = vector.broadcast %cst_10 : f32 to vector<256x128xf32>
      %c0_11 = arith.constant 0 : index
      %c0_12 = arith.constant 0 : index
      %13 = vector.load %arg7[%c0_11, %c0_12] : memref<256x128xf32, #tpu.memory_space<vmem>>, vector<256x128xf32>
      tpu.vector_store %arg7[%c0_11, %c0_12], %12 {strides = array<i32>} : memref<256x128xf32, #tpu.memory_space<vmem>>, vector<256x128xf32>,
    } else {
    }
    %c0 = arith.constant 0 : index
    %c0_1 = arith.constant 0 : index
    %3 = vector.load %arg7[%c0, %c0_1] : memref<256x128xf32, #tpu.memory_space<vmem>>, vector<256x128xf32>
    %c0_2 = arith.constant 0 : index
    %c0_3 = arith.constant 0 : index
    %4 = vector.load %arg3[%c0_2, %c0_3] : memref<256x256xbf16, #tpu.memory_space<vmem>>, vector<256x256xbf16>
    %c0_4 = arith.constant 0 : index
    %c0_5 = arith.constant 0 : index
    %5 = vector.load %arg4[%c0_4, %c0_5] : memref<256x128xbf16, #tpu.memory_space<vmem>>, vector<256x128xbf16>
    %cst = arith.constant dense<0.000000e+00> : vector<256x128xf32>
    %6 = tpu.matmul %4, %5, %cst {dimension_numbers = #tpu.dot_dimension_numbers<[1], [0], [0], [1], [0, 0, 1, 1], [], []>} : vector<256x256xbf16>, vector<256x128xbf16>, vector<256x128xf32> -> vector<256x128xf32>
    %7 = arith.addf %3, %6 : vector<256x128xf32>
    %c0_6 = arith.constant 0 : index
    %c0_7 = arith.constant 0 : index
    %8 = vector.load %arg7[%c0_6, %c0_7] : memref<256x128xf32, #tpu.memory_space<vmem>>, vector<256x128xf32>
    tpu.vector_store %arg7[%c0_6, %c0_7], %7 {strides = array<i32>} : memref<256x128xf32, #tpu.memory_space<vmem>>, vector<256x128xf32>,
    %c0_i32_8 = arith.constant 0 : i32
    %9 = arith.cmpi eq, %arg2, %c0_i32_8 : i32
    %10 = arith.extui %9 : i1 to i32
    %c0_i32_9 = arith.constant 0 : i32
    %11 = arith.cmpi ne, %10, %c0_i32_9 : i32
    scf.if %11 {
      %c0_10 = arith.constant 0 : index
      %c0_11 = arith.constant 0 : index
      %12 = vector.load %arg7[%c0_10, %c0_11] : memref<256x128xf32, #tpu.memory_space<vmem>>, vector<256x128xf32>
      %c0_12 = arith.constant 0 : index
      %c0_13 = arith.constant 0 : index
      %13 = vector.load %arg5[%c0_12, %c0_13] : memref<1x128xf32, #tpu.memory_space<vmem>>, vector<1x128xf32>
      %14 = vector.broadcast %13 : vector<1x128xf32> to vector<256x128xf32>
      %15 = arith.addf %12, %14 : vector<256x128xf32>
      %c0_14 = arith.constant 0 : index
      %c0_15 = arith.constant 0 : index
      %16 = vector.load %arg6[%c0_14, %c0_15] : memref<256x128xf32, #tpu.memory_space<vmem>>, vector<256x128xf32>
      tpu.vector_store %arg6[%c0_14, %c0_15], %15 {strides = array<i32>} : memref<256x128xf32, #tpu.memory_space<vmem>>, vector<256x128xf32>,
    } else {
    }
    return
  }
  func.func @transform_0(%arg0: i32, %arg1: i32, %arg2: i32) -> (i32, i32) {
    %c0_i32 = arith.constant 0 : i32
    return %arg0, %arg2 : i32, i32
  }
  func.func @transform_1(%arg0: i32, %arg1: i32, %arg2: i32) -> (i32, i32) {
    %c0_i32 = arith.constant 0 : i32
    return %arg2, %arg1 : i32, i32
  }
  func.func @transform_2(%arg0: i32, %arg1: i32, %arg2: i32) -> (i32, i32) {
    %c0_i32 = arith.constant 0 : i32
    %c0_i32_0 = arith.constant 0 : i32
    return %c0_i32, %arg1 : i32, i32
  }
  func.func @transform_3(%arg0: i32, %arg1: i32, %arg2: i32) -> (i32, i32) {
    %c0_i32 = arith.constant 0 : i32
    return %arg0, %arg1 : i32, i32
  }
}

module attributes {stable_mosaic.version = 11 : i64} {
  func.func @_bce_sum_kernel(%arg0: i32, %arg1: memref<8x128xf32, #tpu.memory_space<vmem>>, %arg2: memref<1x1xf32, #tpu.memory_space<vmem>>) attributes {dimension_semantics = [#tpu.dimension_semantics<arbitrary>], iteration_bounds = array<i64: 1>, scalar_prefetch = 0 : i64, scratch_operands = 0 : i64, tpu.core_type = #tpu.core_type<tc>, window_params = [{transform_indices = @transform_0, window_bounds = array<i64: 8, 128>}, {pipeline_mode = #tpu.pipeline_mode<synchronous>, transform_indices = @transform_1, window_bounds = array<i64: 1, 1>}]} {
    %c0_i32 = arith.constant 0 : i32
    %0 = arith.cmpi eq, %arg0, %c0_i32 : i32
    %1 = arith.extui %0 : i1 to i32
    %c0_i32_0 = arith.constant 0 : i32
    %2 = arith.cmpi ne, %1, %c0_i32_0 : i32
    scf.if %2 {
      %cst_12 = arith.constant 0.000000e+00 : f32
      %38 = vector.broadcast %cst_12 : f32 to vector<1x1xf32>
      %c0_13 = arith.constant 0 : index
      %c0_14 = arith.constant 0 : index
      %39 = vector.load %arg2[%c0_13, %c0_14] : memref<1x1xf32, #tpu.memory_space<vmem>>, vector<1x1xf32>
      tpu.vector_store %arg2[%c0_13, %c0_14], %38 {strides = array<i32>} : memref<1x1xf32, #tpu.memory_space<vmem>>, vector<1x1xf32>,
    } else {
    }
    %c0 = arith.constant 0 : index
    %c0_1 = arith.constant 0 : index
    %3 = vector.load %arg1[%c0, %c0_1] : memref<8x128xf32, #tpu.memory_space<vmem>>, vector<8x128xf32>
    %4 = tpu.iota {dimensions = array<i32: 0>} : vector<8x128xi32>
    %5 = tpu.iota {dimensions = array<i32: 1>} : vector<8x128xi32>
    %c8_i32 = arith.constant 8 : i32
    %6 = arith.muli %arg0, %c8_i32 : i32
    %7 = vector.broadcast %6 : i32 to vector<8x128xi32>
    %8 = arith.addi %7, %4 : vector<8x128xi32>
    %c128_i32 = arith.constant 128 : i32
    %9 = vector.broadcast %c128_i32 : i32 to vector<8x128xi32>
    %10 = arith.muli %8, %9 : vector<8x128xi32>
    %11 = arith.addi %10, %5 : vector<8x128xi32>
    %cst = arith.constant 0.000000e+00 : f32
    %12 = vector.broadcast %cst : f32 to vector<8x128xf32>
    %13 = arith.maximumf %3, %12 : vector<8x128xf32>
    %cst_2 = arith.constant 1.000000e+00 : f32
    %14 = vector.broadcast %cst_2 : f32 to vector<8x128xf32>
    %15 = arith.mulf %3, %14 : vector<8x128xf32>
    %16 = arith.subf %13, %15 : vector<8x128xf32>
    %17 = math.absf %3 : vector<8x128xf32>
    %cst_3 = arith.constant 0.000000e+00 : f32
    %18 = vector.broadcast %cst_3 : f32 to vector<8x128xf32>
    %19 = arith.subf %18, %17 : vector<8x128xf32>
    %20 = math.exp %19 : vector<8x128xf32>
    %21 = math.log1p %20 : vector<8x128xf32>
    %22 = arith.addf %16, %21 : vector<8x128xf32>
    %c18_i32 = arith.constant 18 : i32
    %23 = vector.broadcast %c18_i32 : i32 to vector<8x128xi32>
    %24 = arith.cmpi slt, %11, %23 : vector<8x128xi32>
    %cst_4 = arith.constant 0.000000e+00 : f32
    %25 = vector.broadcast %cst_4 : f32 to vector<8x128xf32>
    %26 = arith.select %24, %22, %25 : vector<8x128xi1>, vector<8x128xf32>
    %c0_5 = arith.constant 0 : index
    %c0_6 = arith.constant 0 : index
    %27 = vector.load %arg2[%c0_5, %c0_6] : memref<1x1xf32, #tpu.memory_space<vmem>>, vector<1x1xf32>
    %28 = vector.shape_cast %26 : vector<8x128xf32> to vector<1x8x128xf32>
    %cst_7 = arith.constant dense<0.000000e+00> : vector<1xf32>
    %29 = vector.multi_reduction <add>, %28, %cst_7 [1, 2] : vector<1x8x128xf32> to vector<1xf32>
    %30 = vector.shape_cast %29 : vector<1xf32> to vector<1x1x1xf32>
    %31 = vector.extract %30[0, 0, 0] : f32 from vector<1x1x1xf32>
    %32 = vector.broadcast %31 : f32 to vector<1x1xf32>
    %33 = arith.addf %27, %32 : vector<1x1xf32>
    %c0_8 = arith.constant 0 : index
    %c0_9 = arith.constant 0 : index
    %34 = vector.load %arg2[%c0_8, %c0_9] : memref<1x1xf32, #tpu.memory_space<vmem>>, vector<1x1xf32>
    tpu.vector_store %arg2[%c0_8, %c0_9], %33 {strides = array<i32>} : memref<1x1xf32, #tpu.memory_space<vmem>>, vector<1x1xf32>,
    %c0_i32_10 = arith.constant 0 : i32
    %35 = arith.cmpi eq, %arg0, %c0_i32_10 : i32
    %36 = arith.extui %35 : i1 to i32
    %c0_i32_11 = arith.constant 0 : i32
    %37 = arith.cmpi ne, %36, %c0_i32_11 : i32
    scf.if %37 {
      %c0_12 = arith.constant 0 : index
      %c0_13 = arith.constant 0 : index
      %38 = vector.load %arg2[%c0_12, %c0_13] : memref<1x1xf32, #tpu.memory_space<vmem>>, vector<1x1xf32>
      %cst_14 = arith.constant 1.800000e+01 : f32
      %39 = vector.broadcast %cst_14 : f32 to vector<1x1xf32>
      %40 = arith.divf %38, %39 : vector<1x1xf32>
      %c0_15 = arith.constant 0 : index
      %c0_16 = arith.constant 0 : index
      %41 = vector.load %arg2[%c0_15, %c0_16] : memref<1x1xf32, #tpu.memory_space<vmem>>, vector<1x1xf32>
      tpu.vector_store %arg2[%c0_15, %c0_16], %40 {strides = array<i32>} : memref<1x1xf32, #tpu.memory_space<vmem>>, vector<1x1xf32>,
    } else {
    }
    return
  }
  func.func @transform_0(%arg0: i32) -> (i32, i32) {
    %c0_i32 = arith.constant 0 : i32
    %c0_i32_0 = arith.constant 0 : i32
    return %arg0, %c0_i32 : i32, i32
  }
  func.func @transform_1(%arg0: i32) -> (i32, i32) {
    %c0_i32 = arith.constant 0 : i32
    %c0_i32_0 = arith.constant 0 : i32
    %c0_i32_1 = arith.constant 0 : i32
    return %c0_i32, %c0_i32_0 : i32, i32
  }
}

module attributes {stable_mosaic.version = 11 : i64} {
  func.func @_bce_sum_kernel(%arg0: i32, %arg1: memref<8x128xf32, #tpu.memory_space<vmem>>, %arg2: memref<1x1xf32, #tpu.memory_space<vmem>>) attributes {dimension_semantics = [#tpu.dimension_semantics<arbitrary>], iteration_bounds = array<i64: 1>, scalar_prefetch = 0 : i64, scratch_operands = 0 : i64, tpu.core_type = #tpu.core_type<tc>, window_params = [{transform_indices = @transform_0, window_bounds = array<i64: 8, 128>}, {pipeline_mode = #tpu.pipeline_mode<synchronous>, transform_indices = @transform_1, window_bounds = array<i64: 1, 1>}]} {
    %c0_i32 = arith.constant 0 : i32
    %0 = arith.cmpi eq, %arg0, %c0_i32 : i32
    %1 = arith.extui %0 : i1 to i32
    %c0_i32_0 = arith.constant 0 : i32
    %2 = arith.cmpi ne, %1, %c0_i32_0 : i32
    scf.if %2 {
      %cst_12 = arith.constant 0.000000e+00 : f32
      %38 = vector.broadcast %cst_12 : f32 to vector<1x1xf32>
      %c0_13 = arith.constant 0 : index
      %c0_14 = arith.constant 0 : index
      %39 = vector.load %arg2[%c0_13, %c0_14] : memref<1x1xf32, #tpu.memory_space<vmem>>, vector<1x1xf32>
      tpu.vector_store %arg2[%c0_13, %c0_14], %38 {strides = array<i32>} : memref<1x1xf32, #tpu.memory_space<vmem>>, vector<1x1xf32>,
    } else {
    }
    %c0 = arith.constant 0 : index
    %c0_1 = arith.constant 0 : index
    %3 = vector.load %arg1[%c0, %c0_1] : memref<8x128xf32, #tpu.memory_space<vmem>>, vector<8x128xf32>
    %4 = tpu.iota {dimensions = array<i32: 0>} : vector<8x128xi32>
    %5 = tpu.iota {dimensions = array<i32: 1>} : vector<8x128xi32>
    %c8_i32 = arith.constant 8 : i32
    %6 = arith.muli %arg0, %c8_i32 : i32
    %7 = vector.broadcast %6 : i32 to vector<8x128xi32>
    %8 = arith.addi %7, %4 : vector<8x128xi32>
    %c128_i32 = arith.constant 128 : i32
    %9 = vector.broadcast %c128_i32 : i32 to vector<8x128xi32>
    %10 = arith.muli %8, %9 : vector<8x128xi32>
    %11 = arith.addi %10, %5 : vector<8x128xi32>
    %cst = arith.constant 0.000000e+00 : f32
    %12 = vector.broadcast %cst : f32 to vector<8x128xf32>
    %13 = arith.maximumf %3, %12 : vector<8x128xf32>
    %cst_2 = arith.constant 0.000000e+00 : f32
    %14 = vector.broadcast %cst_2 : f32 to vector<8x128xf32>
    %15 = arith.mulf %3, %14 : vector<8x128xf32>
    %16 = arith.subf %13, %15 : vector<8x128xf32>
    %17 = math.absf %3 : vector<8x128xf32>
    %cst_3 = arith.constant 0.000000e+00 : f32
    %18 = vector.broadcast %cst_3 : f32 to vector<8x128xf32>
    %19 = arith.subf %18, %17 : vector<8x128xf32>
    %20 = math.exp %19 : vector<8x128xf32>
    %21 = math.log1p %20 : vector<8x128xf32>
    %22 = arith.addf %16, %21 : vector<8x128xf32>
    %c18_i32 = arith.constant 18 : i32
    %23 = vector.broadcast %c18_i32 : i32 to vector<8x128xi32>
    %24 = arith.cmpi slt, %11, %23 : vector<8x128xi32>
    %cst_4 = arith.constant 0.000000e+00 : f32
    %25 = vector.broadcast %cst_4 : f32 to vector<8x128xf32>
    %26 = arith.select %24, %22, %25 : vector<8x128xi1>, vector<8x128xf32>
    %c0_5 = arith.constant 0 : index
    %c0_6 = arith.constant 0 : index
    %27 = vector.load %arg2[%c0_5, %c0_6] : memref<1x1xf32, #tpu.memory_space<vmem>>, vector<1x1xf32>
    %28 = vector.shape_cast %26 : vector<8x128xf32> to vector<1x8x128xf32>
    %cst_7 = arith.constant dense<0.000000e+00> : vector<1xf32>
    %29 = vector.multi_reduction <add>, %28, %cst_7 [1, 2] : vector<1x8x128xf32> to vector<1xf32>
    %30 = vector.shape_cast %29 : vector<1xf32> to vector<1x1x1xf32>
    %31 = vector.extract %30[0, 0, 0] : f32 from vector<1x1x1xf32>
    %32 = vector.broadcast %31 : f32 to vector<1x1xf32>
    %33 = arith.addf %27, %32 : vector<1x1xf32>
    %c0_8 = arith.constant 0 : index
    %c0_9 = arith.constant 0 : index
    %34 = vector.load %arg2[%c0_8, %c0_9] : memref<1x1xf32, #tpu.memory_space<vmem>>, vector<1x1xf32>
    tpu.vector_store %arg2[%c0_8, %c0_9], %33 {strides = array<i32>} : memref<1x1xf32, #tpu.memory_space<vmem>>, vector<1x1xf32>,
    %c0_i32_10 = arith.constant 0 : i32
    %35 = arith.cmpi eq, %arg0, %c0_i32_10 : i32
    %36 = arith.extui %35 : i1 to i32
    %c0_i32_11 = arith.constant 0 : i32
    %37 = arith.cmpi ne, %36, %c0_i32_11 : i32
    scf.if %37 {
      %c0_12 = arith.constant 0 : index
      %c0_13 = arith.constant 0 : index
      %38 = vector.load %arg2[%c0_12, %c0_13] : memref<1x1xf32, #tpu.memory_space<vmem>>, vector<1x1xf32>
      %cst_14 = arith.constant 1.800000e+01 : f32
      %39 = vector.broadcast %cst_14 : f32 to vector<1x1xf32>
      %40 = arith.divf %38, %39 : vector<1x1xf32>
      %c0_15 = arith.constant 0 : index
      %c0_16 = arith.constant 0 : index
      %41 = vector.load %arg2[%c0_15, %c0_16] : memref<1x1xf32, #tpu.memory_space<vmem>>, vector<1x1xf32>
      tpu.vector_store %arg2[%c0_15, %c0_16], %40 {strides = array<i32>} : memref<1x1xf32, #tpu.memory_space<vmem>>, vector<1x1xf32>,
    } else {
    }
    return
  }
  func.func @transform_0(%arg0: i32) -> (i32, i32) {
    %c0_i32 = arith.constant 0 : i32
    %c0_i32_0 = arith.constant 0 : i32
    return %arg0, %c0_i32 : i32, i32
  }
  func.func @transform_1(%arg0: i32) -> (i32, i32) {
    %c0_i32 = arith.constant 0 : i32
    %c0_i32_0 = arith.constant 0 : i32
    %c0_i32_1 = arith.constant 0 : i32
    return %c0_i32, %c0_i32_0 : i32, i32
  }
}

</mosaic_0001>

<bundles_post_ra>
// kernel: pix2pix_forward.5
= control target key start
LH: loop header
LB: loop body
LE: loop exit
PB: predicated region body
PF: predicated region fallthrough
CT: control target
= control target key end

     0   :  { %s1313_s1 = inlined_call_operand.vmem [shape: bf16[128,128], index: 1, kind: input, shape index: {}]   ;;  %s1314_s0 = inlined_call_operand.vmem [shape: bf16[256,128], index: 0, kind: input, shape index: {}]   ;;  %s1315_s2 = inlined_call_operand.vmem [shape: f32[1,128], index: 2, kind: input, shape index: {}]   ;;  %s1316_s3 = inlined_call_operand.vmem [shape: bf16[256,128], index: 3, kind: output, shape index: {}]  }
   0x1   :  { %v1106_v0 = vld [vmem:[%s1313_s1] sm:$0xff]   ;;  %v1107_v1 = vld [vmem:[%s1313_s1 + $0x8] sm:$0xff]   ;;  %v1108_v2 = vld [vmem:[%s1313_s1 + $0x10] sm:$0xff]  }
   0x2   :  { %1042 = vmatprep.subr.bf16.mxu0 %v1106_v0  ;;  %1090 = vmatprep.subr.bf16.mxu1 %v1106_v0  ;;  %v1109_v3 = vld [vmem:[%s1313_s1 + $0x18] sm:$0xff]   ;;  %v1114_v4 = vld [vmem:[%s1314_s0] sm:$0xff]   ;;  %v1111_v7 = vld [vmem:[%s1313_s1 + $0x28] sm:$0xff]  }
   0x3   :  { %1043 = vmatpush3.bf16.msra.mxu0 %v1106_v0  ;;  %1098 = vmatpush3.bf16.msra.mxu1 %v1106_v0  ;;  %v1115_v5 = vld [vmem:[%s1314_s0 + $0x40] sm:$0xff]   ;;  %v1112_v8 = vld [vmem:[%s1313_s1 + $0x30] sm:$0xff]   ;;  %v1113_v9 = vld [vmem:[%s1313_s1 + $0x38] sm:$0xff]  }
   0x4   :  { %1044 = vmatprep.subr.bf16.mxu0 %v1107_v1  ;;  %1091 = vmatprep.subr.bf16.mxu1 %v1107_v1  ;;  %v1110_v6 = vld [vmem:[%s1313_s1 + $0x20] sm:$0xff]   ;;  %v1116_v10 = vld [vmem:[%s1314_s0 + $0x8] sm:$0xff]   ;;  %v1118_v12 = vld [vmem:[%s1314_s0 + $0x10] sm:$0xff]  }
   0x5   :  { %1058 = vmatprep.mubr.bf16.mxu0 %v1114_v4  ;;  %1074 = vmatprep.mubr.bf16.mxu1 %v1115_v5  ;;  %v1117_v11 = vld [vmem:[%s1314_s0 + $0x48] sm:$0xff]   ;;  %v1119_v13 = vld [vmem:[%s1314_s0 + $0x50] sm:$0xff]   ;;  %v1120_v14 = vld [vmem:[%s1314_s0 + $0x18] sm:$0xff]  }
   0x6   :  { %v1121_v15 = vld [vmem:[%s1314_s0 + $0x58] sm:$0xff]   ;;  %v1122_v16 = vld [vmem:[%s1314_s0 + $0x20] sm:$0xff]   ;;  %v1124_v18 = vld [vmem:[%s1314_s0 + $0x28] sm:$0xff]  }
   0x7   :  { %1045 = vmatpush3.bf16.msra.mxu0 %v1107_v1  ;;  %1099 = vmatpush3.bf16.msra.mxu1 %v1107_v1  ;;  %v1123_v17 = vld [vmem:[%s1314_s0 + $0x60] sm:$0xff]   ;;  %v1125_v19 = vld [vmem:[%s1314_s0 + $0x68] sm:$0xff]   ;;  %v1126_v20 = vld [vmem:[%s1314_s0 + $0x30] sm:$0xff]  }
   0x8   :  { %1046 = vmatprep.subr.bf16.mxu0 %v1108_v2  ;;  %1092 = vmatprep.subr.bf16.mxu1 %v1108_v2  ;;  %v1127_v21 = vld [vmem:[%s1314_s0 + $0x70] sm:$0xff]   ;;  %v1128_v22 = vld [vmem:[%s1314_s0 + $0x38] sm:$0xff]   ;;  %v1225_v24 = vld [vmem:[%s1315_s2] ss:$0 sm:$0xff] }
   0x9   :  { %v1129_v23 = vld [vmem:[%s1314_s0 + $0x78] sm:$0xff]  }
   0xb   :  { %1047 = vmatpush3.bf16.msra.mxu0 %v1108_v2  ;;  %1100 = vmatpush3.bf16.msra.mxu1 %v1108_v2 }
   0xc   :  { %1048 = vmatprep.subr.bf16.mxu0 %v1109_v3  ;;  %1093 = vmatprep.subr.bf16.mxu1 %v1109_v3 }
   0xf   :  { %1049 = vmatpush3.bf16.msra.mxu0 %v1109_v3  ;;  %1101 = vmatpush3.bf16.msra.mxu1 %v1109_v3 }
  0x10   :  { %1050 = vmatprep.subr.bf16.mxu0 %v1110_v6  ;;  %1094 = vmatprep.subr.bf16.mxu1 %v1110_v6 }
  0x13   :  { %1051 = vmatpush3.bf16.msra.mxu0 %v1110_v6  ;;  %1102 = vmatpush3.bf16.msra.mxu1 %v1110_v6 }
  0x14   :  { %1052 = vmatprep.subr.bf16.mxu0 %v1111_v7  ;;  %1095 = vmatprep.subr.bf16.mxu1 %v1111_v7 }
  0x17   :  { %1053 = vmatpush3.bf16.msra.mxu0 %v1111_v7  ;;  %1103 = vmatpush3.bf16.msra.mxu1 %v1111_v7 }
  0x18   :  { %1054 = vmatprep.subr.bf16.mxu0 %v1112_v8  ;;  %1096 = vmatprep.subr.bf16.mxu1 %v1112_v8 }
  0x1b   :  { %1055 = vmatpush3.bf16.msra.mxu0 %v1112_v8  ;;  %1104 = vmatpush3.bf16.msra.mxu1 %v1112_v8 }
  0x1c   :  { %1056 = vmatprep.subr.bf16.mxu0 %v1113_v9  ;;  %1097 = vmatprep.subr.bf16.mxu1 %v1113_v9 }
  0x1f   :  { %1057 = vmatpush3.bf16.msra.mxu0 %v1113_v9  ;;  %1105 = vmatpush3.bf16.msra.mxu1 %v1113_v9 }
  0x22   :  { %1059 = vmatmul.mubr.bf16.vlgmr.msra.gmra.mrb[0].mxu0 %v1116_v10  ;;  %1075 = vmatmul.mubr.bf16.vlgmr.msra.gmra.mrb[0].mxu1 %v1117_v11 }
  0x23   :  { %1062 = vmatprep.mubr.bf16.mxu0 %v1118_v12  ;;  %1078 = vmatprep.mubr.bf16.mxu1 %v1119_v13 }
  0x2a   :  { %1063 = vmatmul.mubr.bf16.gmra.mrb[4].mxu0 %v1120_v14  ;;  %1079 = vmatmul.mubr.bf16.gmra.mrb[4].mxu1 %v1121_v15 }
  0x2b   :  { %1066 = vmatprep.mubr.bf16.mxu0 %v1122_v16  ;;  %1082 = vmatprep.mubr.bf16.mxu1 %v1123_v17 }
  0x32   :  { %1067 = vmatmul.mubr.bf16.gmra.mrb[8].mxu0 %v1124_v18  ;;  %1083 = vmatmul.mubr.bf16.gmra.mrb[8].mxu1 %v1125_v19 }
  0x33   :  { %1070 = vmatprep.mubr.bf16.mxu0 %v1126_v20  ;;  %1086 = vmatprep.mubr.bf16.mxu1 %v1127_v21 }
  0x3a   :  { %1071 = vmatmul.mubr.bf16.gmra.mrb[12].mxu0 %v1128_v22  ;;  %1087 = vmatmul.mubr.bf16.gmra.mrb[12].mxu1 %v1129_v23 }
  0xf5   :  { %v1060_v25 = vpop.f32.mrb[0].mxu0  ;;  %v1076_v26 = vpop.f32.mrb[0].mxu1 }
  0xf6   :  { %v544_v27 = vadd.f32 %v1060_v25, %v1225_v24  ;;  %v560_v28 = vadd.f32 %v1076_v26, %v1225_v24  ;;  %v309_v29 = vpop.f32.mrb[1].mxu0  ;;  %v373_v30 = vpop.f32.mrb[1].mxu1 }
  0xf7   :  { %v542_v31 = vadd.f32 %v1225_v24, %v309_v29  ;;  %v558_v32 = vadd.f32 %v1225_v24, %v373_v30  ;;  %v1061_v33 = vpop.f32.mrb[2].mxu0  ;;  %v1077_v34 = vpop.f32.mrb[2].mxu1 }
  0xf8   :  { %vm576_vm0 = vcmp.ge.f32.partialorder %v544_v27, 0.0  ;;  %v608_v35 = vmul.f32 0.2, %v544_v27  ;;  %vm592_vm1 = vcmp.ge.f32.partialorder %v560_v28, 0.0  ;;  %v624_v36 = vmul.f32 0.2, %v560_v28 }
  0xf9   :  { %vm574_vm2 = vcmp.ge.f32.partialorder %v542_v31, 0.0  ;;  %v606_v37 = vmul.f32 0.2, %v542_v31  ;;  %vm590_vm3 = vcmp.ge.f32.partialorder %v558_v32, 0.0  ;;  %v622_v38 = vmul.f32 0.2, %v558_v32 }
  0xfa   :  { %v545_v39 = vadd.f32 %v1061_v33, %v1225_v24  ;;  %v561_v40 = vadd.f32 %v1077_v34, %v1225_v24  ;;  %v312_v41 = vpop.f32.mrb[3].mxu0  ;;  %v376_v42 = vpop.f32.mrb[3].mxu1  ;;  %v640_v43 = vsel %vm576_vm0, %v544_v27, %v608_v35  ;;  %v656_v44 = vsel %vm592_vm1, %v560_v28, %v624_v36 }
  0xfb   :  { %v543_v45 = vadd.f32 %v1225_v24, %v312_v41  ;;  %v559_v46 = vadd.f32 %v1225_v24, %v376_v42  ;;  %v638_v51 = vsel %vm574_vm2, %v542_v31, %v606_v37  ;;  %v654_v52 = vsel %vm590_vm3, %v558_v32, %v622_v38 }
  0xfc   :  { %vm577_vm4 = vcmp.ge.f32.partialorder %v545_v39, 0.0  ;;  %v609_v47 = vmul.f32 0.2, %v545_v39  ;;  %vm593_vm5 = vcmp.ge.f32.partialorder %v561_v40, 0.0  ;;  %v625_v48 = vmul.f32 0.2, %v561_v40 }
  0xfd   :  { %vm575_vm6 = vcmp.ge.f32.partialorder %v543_v45, 0.0  ;;  %v607_v49 = vmul.f32 0.2, %v543_v45  ;;  %vm591_vm7 = vcmp.ge.f32.partialorder %v559_v46, 0.0  ;;  %v623_v50 = vmul.f32 0.2, %v559_v46 }
  0xfe   :  { %v641_v53 = vsel %vm577_vm4, %v545_v39, %v609_v47  ;;  %v657_v54 = vsel %vm593_vm5, %v561_v40, %v625_v48  ;;  %v1064_v55 = vpop.f32.mrb[4].mxu0  ;;  %v1080_v56 = vpop.f32.mrb[4].mxu1 }
  0xff   :  { %v931_v57 = vpack.c.bf16 %v641_v53, %v640_v43  ;;  %v971_v58 = vpack.c.bf16 %v657_v54, %v656_v44  ;;  %v639_v59 = vsel %vm575_vm6, %v543_v45, %v607_v49  ;;  %v655_v60 = vsel %vm591_vm7, %v559_v46, %v623_v50  ;;  %v325_v61 = vpop.f32.mrb[5].mxu0  ;;  %v389_v62 = vpop.f32.mrb[5].mxu1 }
 0x100   :  { %v926_v63 = vpack.c.bf16 %v639_v59, %v638_v51  ;;  %v966_v0 = vpack.c.bf16 %v655_v60, %v654_v52  ;;  %v548_v1 = vadd.f32 %v1064_v55, %v1225_v24  ;;  %v564_v2 = vadd.f32 %v1080_v56, %v1225_v24  ;;  %v1065_v3 = vpop.f32.mrb[6].mxu0  ;;  %v1081_v4 = vpop.f32.mrb[6].mxu1 }
 0x101   :  { %1003 = vst [vmem:[%s1316_s3 + $0x8] sm:$0xff] %v931_v57   ;;  %1011 = vst [vmem:[%s1316_s3 + $0x48] sm:$0xff] %v971_v58   ;;  %v546_v5 = vadd.f32 %v1225_v24, %v325_v61  ;;  %v562_v6 = vadd.f32 %v1225_v24, %v389_v62  ;;  %v549_v7 = vadd.f32 %v1065_v3, %v1225_v24  ;;  %v328_v9 = vpop.f32.mrb[7].mxu0  ;;  %v392_v10 = vpop.f32.mrb[7].mxu1 }
 0x102   :  { %v565_v8 = vadd.f32 %v1081_v4, %v1225_v24  ;;  %927 = vst [vmem:[%s1316_s3] sm:$0xff] %v926_v63   ;;  %1010 = vst [vmem:[%s1316_s3 + $0x40] sm:$0xff] %v966_v0   ;;  %vm580_vm8 = vcmp.ge.f32.partialorder %v548_v1, 0.0  ;;  %v612_v11 = vmul.f32 0.2, %v548_v1  ;;  %vm596_vm9 = vcmp.ge.f32.partialorder %v564_v2, 0.0 }
 0x103   :  { %v628_v12 = vmul.f32 0.2, %v564_v2  ;;  %vm578_vm10 = vcmp.ge.f32.partialorder %v546_v5, 0.0  ;;  %v610_v13 = vmul.f32 0.2, %v546_v5  ;;  %vm594_vm11 = vcmp.ge.f32.partialorder %v562_v6, 0.0 }
 0x104   :  { %v644_v14 = vsel %vm580_vm8, %v548_v1, %v612_v11  ;;  %v626_v15 = vmul.f32 0.2, %v562_v6  ;;  %vm581_vm12 = vcmp.ge.f32.partialorder %v549_v7, 0.0  ;;  %v613_v16 = vmul.f32 0.2, %v549_v7 }
 0x105   :  { %v660_v17 = vsel %vm596_vm9, %v564_v2, %v628_v12  ;;  %v642_v18 = vsel %vm578_vm10, %v546_v5, %v610_v13  ;;  %vm597_vm13 = vcmp.ge.f32.partialorder %v565_v8, 0.0  ;;  %v629_v19 = vmul.f32 0.2, %v565_v8  ;;  %v1068_v20 = vpop.f32.mrb[8].mxu0  ;;  %v1084_v21 = vpop.f32.mrb[8].mxu1 }
 0x106   :  { %v645_v22 = vsel %vm581_vm12, %v549_v7, %v613_v16  ;;  %v547_v23 = vadd.f32 %v1225_v24, %v328_v9  ;;  %v563_v25 = vadd.f32 %v1225_v24, %v392_v10  ;;  %v552_v26 = vadd.f32 %v1068_v20, %v1225_v24  ;;  %v341_v27 = vpop.f32.mrb[9].mxu0  ;;  %v405_v28 = vpop.f32.mrb[9].mxu1 }
 0x107   :  { %v941_v29 = vpack.c.bf16 %v645_v22, %v644_v14  ;;  %v661_v30 = vsel %vm597_vm13, %v565_v8, %v629_v19  ;;  %v568_v31 = vadd.f32 %v1084_v21, %v1225_v24  ;;  %v550_v32 = vadd.f32 %v1225_v24, %v341_v27  ;;  %v1069_v33 = vpop.f32.mrb[10].mxu0  ;;  %v1085_v34 = vpop.f32.mrb[10].mxu1 }
 0x108   :  { %v981_v35 = vpack.c.bf16 %v661_v30, %v660_v17  ;;  %vm579_vm14 = vcmp.ge.f32.partialorder %v547_v23, 0.0  ;;  %v611_v36 = vmul.f32 0.2, %v547_v23  ;;  %vm595_vm15 = vcmp.ge.f32.partialorder %v563_v25, 0.0  ;;  %v344_v37 = vpop.f32.mrb[11].mxu0  ;;  %v408_v38 = vpop.f32.mrb[11].mxu1 }
 0x109   :  { %1005 = vst [vmem:[%s1316_s3 + $0x18] sm:$0xff] %v941_v29   ;;  %v627_v39 = vmul.f32 0.2, %v563_v25  ;;  %vm584_vm0 = vcmp.ge.f32.partialorder %v552_v26, 0.0  ;;  %v616_v40 = vmul.f32 0.2, %v552_v26  ;;  %v658_v41 = vsel %vm594_vm11, %v562_v6, %v626_v15 }
 0x10a   :  { %vm600_vm1 = vcmp.ge.f32.partialorder %v568_v31, 0.0  ;;  %1013 = vst [vmem:[%s1316_s3 + $0x58] sm:$0xff] %v981_v35   ;;  %v643_v42 = vsel %vm579_vm14, %v547_v23, %v611_v36  ;;  %v632_v43 = vmul.f32 0.2, %v568_v31  ;;  %vm582_vm2 = vcmp.ge.f32.partialorder %v550_v32, 0.0 }
 0x10b   :  { %v936_v44 = vpack.c.bf16 %v643_v42, %v642_v18  ;;  %v659_v45 = vsel %vm595_vm15, %v563_v25, %v627_v39  ;;  %v614_v46 = vmul.f32 0.2, %v550_v32  ;;  %v566_v47 = vadd.f32 %v1225_v24, %v405_v28 }
 0x10c   :  { %v976_v48 = vpack.c.bf16 %v659_v45, %v658_v41  ;;  %v648_v49 = vsel %vm584_vm0, %v552_v26, %v616_v40  ;;  %v664_v50 = vsel %vm600_vm1, %v568_v31, %v632_v43  ;;  %v553_v51 = vadd.f32 %v1069_v33, %v1225_v24 }
 0x10d   :  { %1004 = vst [vmem:[%s1316_s3 + $0x10] sm:$0xff] %v936_v44   ;;  %vm598_vm3 = vcmp.ge.f32.partialorder %v566_v47, 0.0  ;;  %v630_v52 = vmul.f32 0.2, %v566_v47  ;;  %v569_v53 = vadd.f32 %v1085_v34, %v1225_v24  ;;  %v551_v54 = vadd.f32 %v1225_v24, %v344_v37  ;;  %v1072_v55 = vpop.f32.mrb[12].mxu0  ;;  %v1088_v56 = vpop.f32.mrb[12].mxu1 }
 0x10e   :  { %1012 = vst [vmem:[%s1316_s3 + $0x50] sm:$0xff] %v976_v48   ;;  %vm585_vm4 = vcmp.ge.f32.partialorder %v553_v51, 0.0  ;;  %v617_v57 = vmul.f32 0.2, %v553_v51  ;;  %v567_v58 = vadd.f32 %v1225_v24, %v408_v38  ;;  %v556_v59 = vadd.f32 %v1072_v55, %v1225_v24  ;;  %v357_v60 = vpop.f32.mrb[13].mxu0  ;;  %v421_v61 = vpop.f32.mrb[13].mxu1 }
 0x10f   :  { %v646_v62 = vsel %vm582_vm2, %v550_v32, %v614_v46  ;;  %vm601_vm5 = vcmp.ge.f32.partialorder %v569_v53, 0.0  ;;  %v633_v63 = vmul.f32 0.2, %v569_v53  ;;  %vm583_vm6 = vcmp.ge.f32.partialorder %v551_v54, 0.0  ;;  %v1073_v0 = vpop.f32.mrb[14].mxu0  ;;  %v1089_v1 = vpop.f32.mrb[14].mxu1 }
 0x110   :  { %v649_v2 = vsel %vm585_vm4, %v553_v51, %v617_v57  ;;  %v615_v3 = vmul.f32 0.2, %v551_v54  ;;  %vm599_vm7 = vcmp.ge.f32.partialorder %v567_v58, 0.0  ;;  %v631_v4 = vmul.f32 0.2, %v567_v58  ;;  %v360_v5 = vpop.f32.mrb[15].mxu0 }
 0x111   :  { %v662_v6 = vsel %vm598_vm3, %v566_v47, %v630_v52  ;;  %v951_v7 = vpack.c.bf16 %v649_v2, %v648_v49  ;;  %v665_v8 = vsel %vm601_vm5, %v569_v53, %v633_v63  ;;  %v620_v9 = vmul.f32 0.2, %v556_v59  ;;  %v424_v10 = vpop.f32.mrb[15].mxu1 }
 0x112   :  { %v991_v11 = vpack.c.bf16 %v665_v8, %v664_v50  ;;  %v647_v12 = vsel %vm583_vm6, %v551_v54, %v615_v3  ;;  %v663_v13 = vsel %vm599_vm7, %v567_v58, %v631_v4  ;;  %v572_v14 = vadd.f32 %v1088_v56, %v1225_v24 }
 0x113   :  { %1007 = vst [vmem:[%s1316_s3 + $0x28] sm:$0xff] %v951_v7   ;;  %v946_v15 = vpack.c.bf16 %v647_v12, %v646_v62  ;;  %v986_v16 = vpack.c.bf16 %v663_v13, %v662_v6  ;;  %vm588_vm8 = vcmp.ge.f32.partialorder %v556_v59, 0.0  ;;  %v554_v17 = vadd.f32 %v1225_v24, %v357_v60 }
 0x114   :  { %1015 = vst [vmem:[%s1316_s3 + $0x68] sm:$0xff] %v991_v11   ;;  %vm604_vm9 = vcmp.ge.f32.partialorder %v572_v14, 0.0  ;;  %v636_v18 = vmul.f32 0.2, %v572_v14  ;;  %v570_v19 = vadd.f32 %v1225_v24, %v421_v61  ;;  %v557_v20 = vadd.f32 %v1073_v0, %v1225_v24 }
 0x115   :  { %1006 = vst [vmem:[%s1316_s3 + $0x20] sm:$0xff] %v946_v15   ;;  %1014 = vst [vmem:[%s1316_s3 + $0x60] sm:$0xff] %v986_v16   ;;  %v618_v21 = vmul.f32 0.2, %v554_v17  ;;  %v573_v22 = vadd.f32 %v1089_v1, %v1225_v24  ;;  %v555_v23 = vadd.f32 %v1225_v24, %v360_v5  ;;  %v652_v25 = vsel %vm588_vm8, %v556_v59, %v620_v9 }
 0x116   :  { %vm586_vm10 = vcmp.ge.f32.partialorder %v554_v17, 0.0  ;;  %vm589_vm11 = vcmp.ge.f32.partialorder %v557_v20, 0.0  ;;  %v668_v26 = vsel %vm604_vm9, %v572_v14, %v636_v18  ;;  %v621_v27 = vmul.f32 0.2, %v557_v20 }
 0x117   :  { %vm605_vm12 = vcmp.ge.f32.partialorder %v573_v22, 0.0  ;;  %v637_v28 = vmul.f32 0.2, %v573_v22  ;;  %vm602_vm13 = vcmp.ge.f32.partialorder %v570_v19, 0.0  ;;  %vm587_vm14 = vcmp.ge.f32.partialorder %v555_v23, 0.0 }
 0x118   :  { %v619_v29 = vmul.f32 0.2, %v555_v23  ;;  %v571_v30 = vadd.f32 %v1225_v24, %v424_v10  ;;  %v650_v31 = vsel %vm586_vm10, %v554_v17, %v618_v21  ;;  %v634_v32 = vmul.f32 0.2, %v570_v19 }
 0x119   :  { %v653_v33 = vsel %vm589_vm11, %v557_v20, %v621_v27  ;;  %v669_v34 = vsel %vm605_vm12, %v573_v22, %v637_v28 }
 0x11a   :  { %v961_v35 = vpack.c.bf16 %v653_v33, %v652_v25  ;;  %v1001_v36 = vpack.c.bf16 %v669_v34, %v668_v26  ;;  %v651_v37 = vsel %vm587_vm14, %v555_v23, %v619_v29  ;;  %vm603_vm15 = vcmp.ge.f32.partialorder %v571_v30, 0.0 }
 0x11b   :  { %v956_v38 = vpack.c.bf16 %v651_v37, %v650_v31  ;;  %v635_v39 = vmul.f32 0.2, %v571_v30  ;;  %v666_v24 = vsel %vm602_vm13, %v570_v19, %v634_v32 }
 0x11c   :  { %1009 = vst [vmem:[%s1316_s3 + $0x38] sm:$0xff] %v961_v35   ;;  %1017 = vst [vmem:[%s1316_s3 + $0x78] sm:$0xff] %v1001_v36  }
 0x11d   :  { %1008 = vst [vmem:[%s1316_s3 + $0x30] sm:$0xff] %v956_v38   ;;  %v667_v40 = vsel %vm603_vm15, %v571_v30, %v635_v39 }
 0x11e   :  { %v996_v41 = vpack.c.bf16 %v667_v40, %v666_v24 }
 0x120   :  { %1016 = vst [vmem:[%s1316_s3 + $0x70] sm:$0xff] %v996_v41  }

// kernel: pix2pix_forward.9
= control target key start
LH: loop header
LB: loop body
LE: loop exit
PB: predicated region body
PF: predicated region fallthrough
CT: control target
= control target key end

     0   :  { %s140_s0 = inlined_call_operand.vmem [shape: f32[8,128], index: 0, kind: input, shape index: {}]   ;;  %s141_s1 = inlined_call_operand.hbm [shape: f32[1,1], index: 1, kind: output, shape index: {}]  }
   0x1   :  { %v15_v0 = vld [vmem:[%s140_s0] sm:$0xff] }
   0x2   :  { %6 = vsyncpa [#allocation3], 0  ;;  %v27_v1 = vand.u32 2147483647, %v15_v0  ;;  %v16_v5 = vlaneseq  ;;  %v25_v12 = vmax.f32 %v15_v0, 0.0  ;;  %vm13_vm2 = vcmask 0  }
   0x3   :  { %v110_v22 = vmov 0.0   ;;  %s111_s8 = smov [#allocation2]  }
   0x4   :  { %v28_v2 = vsub.f32 0.0, %v27_v1  ;;  %v17_v7 = vshrl.u32 %v16_v5, 7  ;;  %v19_v9 = vand.u32 127, %v16_v5  ;;  %v26_v17 = vsub.f32 %v25_v12, %v15_v0  ;;  %14 = vst.msk [vmem:[#allocation2] sm:$0x1] %vm13_vm2, %v110_v22  ;;  %s70_s9 = sshll.u32 %s111_s8, 4  ;;  %s71_s9 = int_to_ptr.vmem [resolvable:$true] %s70_s9 }
   0x5   :  { %s86_s10 = scalar_lea.vmem %s71_s9, 16  ;;  %s90_s11 = scalar_lea.vmem %s71_s9, 32 }
   0x6   :  { %v29_v3 = vmul.f32 1.442695, %v28_v2  ;;  %v23_v10 = vmul.u32 128, %v17_v7  ;;  %p87_p0 = scmp.ne.s32.totalorder %s71_s9, %s86_s10  ;;  %p91_p1 = scmp.lt.s32.totalorder %s71_s9, %s71_s9 }
   0x7   :  { %p92_p2 = scmp.lt.s32.totalorder %s90_s11, %s86_s10 }
   0x8   :  { %82 = vpow2.f32 %v29_v3  ;;  %v24_v14 = vadd.s32 %v23_v10, %v19_v9 }
   0x9   :  { %p93_p3 = por %p92_p2, %p91_p1 }
   0xa   :  { %vm41_vm1 = vcmp.lt.s32.totalorder %v24_v14, 18 }
   0xb   :  { %v43_v30 = vld [vmem:[#allocation2] sm:$0x1]  ;;  %p94_p4 = pnand %p93_p3, %p87_p0 }
  0x12   :  { %v83_v4 = vpop.eup %82 }
  0x13   :  { %v31_v6 = vadd.f32 1.0, %v83_v4  ;;  %v34_v8 = vmul.f32 -0.5, %v83_v4  ;;  %v37_v13 = vand.u32 2147483647, %v83_v4 }
  0x15   :  { %84 = vlog2.f32 %v31_v6  ;;  %v35_v11 = vadd.f32 1.0, %v34_v8  ;;  %vm38_vm0 = vcmp.lt.f32.partialorder %v37_v13, 0.0004427343 }
  0x17   :  { %v36_v15 = vmul.f32 %v83_v4, %v35_v11 }
  0x1f   :  { %v85_v16 = vpop.eup %84 }
  0x20   :  { %v33_v18 = vmul.f32 0.6931472, %v85_v16 }
  0x22   :  { %v39_v19 = vsel %vm38_vm0, %v36_v15, %v33_v18 }
  0x23   :  { %v40_v20 = vadd.f32 %v39_v19, %v26_v17 }
  0x25   :  { %v42_v21 = vsel %vm41_vm1, %v40_v20, 0.0 }
  0x26   :  { %44 = vadd.xlane.f32.xlu0 %v42_v21 }
  0xb3   :  { %v45_v23 = vpop.xlane.xlu0 %44 }
  0xb4   :  { %v46_v24 = vrot.slane %v45_v23, 4 }
  0xb6   :  { %v47_v25 = vadd.f32 %v46_v24, %v45_v23 }
  0xb8   :  { %v48_v26 = vrot.slane %v47_v25, 2 }
  0xba   :  { %v49_v27 = vadd.f32 %v48_v26, %v47_v25 }
  0xbc   :  { %v50_v28 = vrot.slane %v49_v27, 1 }
  0xbe   :  { %v51_v29 = vadd.f32 %v50_v28, %v49_v27 }
  0xc0   :  { %78 = vpush %v51_v29 }
  0xf1   :  { %s79_s0 = spop %78 }
  0xf2   :  { %v53_v31 = vstv %s79_s0 }
  0xf3   :  { %v54_v32 = vadd.f32 %v53_v31, %v43_v30 }
  0xf5   :  { %56 = vst.msk [vmem:[#allocation2] sm:$0x1] %vm13_vm2, %v54_v32 }
  0xfc   :  { %v60_v33 = vld [vmem:[#allocation2] sm:$0x1] }
  0xfd   :  { %v62_v34 = vmul.f32 0.055555556, %v60_v33 }
  0xff   :  { %63 = vst.msk [vmem:[#allocation2] sm:$0x1] %vm13_vm2, %v62_v34 }
 0x100   :  { %97 = shalt.err (!%p94_p4)
}
 0x101   :  { %s98_s14 = scalar_lea.hbm %s141_s1, 16 }
 0x102   :  { %p99_p5 = scmp.ne.s32.totalorder %s141_s1, %s98_s14  ;;  %p102_p6 = scmp.lt.u32.totalorder %s98_s14, %s141_s1 }
 0x104   :  { %p104_p7 = pnand %p102_p6, %p99_p5 }
 0x106   :  { %107 = shalt.err (!%p104_p7)
}
 0x107   :  { %73 = dma.vmem_to_hbm [thread:$0]  %s71_s9, 16, %s141_s1, [#allocation3]  }
 0x108   :  { %108 = dma.done.wait [#allocation3], 16  }
 0x109   :  { %109 = vsyncadd [#allocation3], 4294967280 }
 0x10a   :  { %77 = vsyncpa [#allocation3], 1 }

// kernel: pix2pix_forward.7
= control target key start
LH: loop header
LB: loop body
LE: loop exit
PB: predicated region body
PF: predicated region fallthrough
CT: control target
= control target key end

     0   :  { %s1276_s1 = inlined_call_operand.vmem [shape: bf16[256,128], index: 1, kind: input, shape index: {}]   ;;  %s1277_s0 = inlined_call_operand.vmem [shape: bf16[256,256], index: 0, kind: input, shape index: {}]   ;;  %s1278_s2 = inlined_call_operand.vmem [shape: f32[1,128], index: 2, kind: input, shape index: {}]   ;;  %s1279_s3 = inlined_call_operand.vmem [shape: f32[256,128], index: 3, kind: output, shape index: {}]  }
   0x1   :  { %v915_v0 = vld [vmem:[%s1276_s1 + $0x40] sm:$0xff]   ;;  %v917_v2 = vld [vmem:[%s1276_s1 + $0x48] sm:$0xff]   ;;  %v919_v4 = vld [vmem:[%s1276_s1 + $0x50] sm:$0xff]  }
   0x2   :  { %v916_v1 = vld [vmem:[%s1276_s1] sm:$0xff]   ;;  %787 = vmatprep.subr.bf16.mxu0 %v915_v0  ;;  %899 = vmatprep.subr.bf16.mxu1 %v915_v0  ;;  %v918_v3 = vld [vmem:[%s1276_s1 + $0x8] sm:$0xff]   ;;  %v920_v5 = vld [vmem:[%s1276_s1 + $0x10] sm:$0xff]  }
   0x3   :  { %788 = vmatpush3.bf16.msra.mxu0 %v916_v1  ;;  %907 = vmatpush3.bf16.msra.mxu1 %v916_v1  ;;  %v921_v6 = vld [vmem:[%s1276_s1 + $0x58] sm:$0xff]   ;;  %v923_v8 = vld [vmem:[%s1276_s1 + $0x60] sm:$0xff]   ;;  %v925_v10 = vld [vmem:[%s1276_s1 + $0x68] sm:$0xff]  }
   0x4   :  { %789 = vmatprep.subr.bf16.mxu0 %v917_v2  ;;  %900 = vmatprep.subr.bf16.mxu1 %v917_v2  ;;  %v922_v7 = vld [vmem:[%s1276_s1 + $0x18] sm:$0xff]   ;;  %v924_v9 = vld [vmem:[%s1276_s1 + $0x20] sm:$0xff]   ;;  %v926_v13 = vld [vmem:[%s1276_s1 + $0x28] sm:$0xff]  }
   0x5   :  { %v933_v11 = vld [vmem:[%s1277_s0 + $0x4] ss:$8 sps:$4 sm:$0xff]   ;;  %v927_v14 = vld [vmem:[%s1276_s1 + $0x70] sm:$0xff]   ;;  %v929_v16 = vld [vmem:[%s1276_s1 + $0x78] sm:$0xff]  }
   0x6   :  { %v936_v12 = vld [vmem:[%s1277_s0 + $0x84] ss:$8 sps:$4 sm:$0xff]   ;;  %435 = vmatprep.mubr.bf16.mxu0 %v933_v11  ;;  %v928_v15 = vld [vmem:[%s1276_s1 + $0x30] sm:$0xff]   ;;  %v930_v17 = vld [vmem:[%s1276_s1 + $0x38] sm:$0xff]  }
   0x7   :  { %790 = vmatpush3.bf16.msra.mxu0 %v918_v3  ;;  %908 = vmatpush3.bf16.msra.mxu1 %v918_v3  ;;  %v931_v18 = vld [vmem:[%s1277_s0] ss:$8 sps:$4 sm:$0xff]   ;;  %v937_v20 = vld [vmem:[%s1277_s0 + $0x14] ss:$8 sps:$4 sm:$0xff]   ;;  %v941_v22 = vld [vmem:[%s1277_s0 + $0x10] ss:$8 sps:$4 sm:$0xff]  }
   0x8   :  { %791 = vmatprep.subr.bf16.mxu0 %v919_v4  ;;  %901 = vmatprep.subr.bf16.mxu1 %v919_v4  ;;  %v934_v19 = vld [vmem:[%s1277_s0 + $0x80] ss:$8 sps:$4 sm:$0xff]   ;;  %v939_v21 = vld [vmem:[%s1277_s0 + $0x94] ss:$8 sps:$4 sm:$0xff]   ;;  %v942_v23 = vld [vmem:[%s1277_s0 + $0x90] ss:$8 sps:$4 sm:$0xff]  }
   0x9   :  { %499 = vmatprep.mubr.bf16.mxu1 %v936_v12  ;;  %v943_v24 = vld [vmem:[%s1277_s0 + $0x24] ss:$8 sps:$4 sm:$0xff]   ;;  %v947_v26 = vld [vmem:[%s1277_s0 + $0x20] ss:$8 sps:$4 sm:$0xff]   ;;  %v949_v28 = vld [vmem:[%s1277_s0 + $0x34] ss:$8 sps:$4 sm:$0xff]  }
   0xa   :  { %v945_v25 = vld [vmem:[%s1277_s0 + $0xa4] ss:$8 sps:$4 sm:$0xff]   ;;  %v948_v27 = vld [vmem:[%s1277_s0 + $0xa0] ss:$8 sps:$4 sm:$0xff]   ;;  %v951_v29 = vld [vmem:[%s1277_s0 + $0xb4] ss:$8 sps:$4 sm:$0xff]  }
   0xb   :  { %792 = vmatpush3.bf16.msra.mxu0 %v920_v5  ;;  %909 = vmatpush3.bf16.msra.mxu1 %v920_v5  ;;  %v953_v30 = vld [vmem:[%s1277_s0 + $0x30] ss:$8 sps:$4 sm:$0xff]   ;;  %v955_v32 = vld [vmem:[%s1277_s0 + $0x44] ss:$8 sps:$4 sm:$0xff]   ;;  %v959_v34 = vld [vmem:[%s1277_s0 + $0x40] ss:$8 sps:$4 sm:$0xff]  }
   0xc   :  { %793 = vmatprep.subr.bf16.mxu0 %v921_v6  ;;  %902 = vmatprep.subr.bf16.mxu1 %v921_v6  ;;  %v954_v31 = vld [vmem:[%s1277_s0 + $0xb0] ss:$8 sps:$4 sm:$0xff]   ;;  %v957_v33 = vld [vmem:[%s1277_s0 + $0xc4] ss:$8 sps:$4 sm:$0xff]   ;;  %v960_v35 = vld [vmem:[%s1277_s0 + $0xc0] ss:$8 sps:$4 sm:$0xff]  }
   0xd   :  { %v961_v36 = vld [vmem:[%s1277_s0 + $0x54] ss:$8 sps:$4 sm:$0xff]   ;;  %v965_v38 = vld [vmem:[%s1277_s0 + $0x50] ss:$8 sps:$4 sm:$0xff]   ;;  %v967_v40 = vld [vmem:[%s1277_s0 + $0x64] ss:$8 sps:$4 sm:$0xff]  }
   0xe   :  { %v963_v37 = vld [vmem:[%s1277_s0 + $0xd4] ss:$8 sps:$4 sm:$0xff]   ;;  %v966_v39 = vld [vmem:[%s1277_s0 + $0xd0] ss:$8 sps:$4 sm:$0xff]   ;;  %v969_v41 = vld [vmem:[%s1277_s0 + $0xe4] ss:$8 sps:$4 sm:$0xff]  }
   0xf   :  { %794 = vmatpush3.bf16.msra.mxu0 %v922_v7  ;;  %910 = vmatpush3.bf16.msra.mxu1 %v922_v7  ;;  %v971_v42 = vld [vmem:[%s1277_s0 + $0x60] ss:$8 sps:$4 sm:$0xff]   ;;  %v973_v44 = vld [vmem:[%s1277_s0 + $0x74] ss:$8 sps:$4 sm:$0xff]   ;;  %v977_v46 = vld [vmem:[%s1277_s0 + $0x70] ss:$8 sps:$4 sm:$0xff]  }
  0x10   :  { %795 = vmatprep.subr.bf16.mxu0 %v923_v8  ;;  %903 = vmatprep.subr.bf16.mxu1 %v923_v8  ;;  %v972_v43 = vld [vmem:[%s1277_s0 + $0xe0] ss:$8 sps:$4 sm:$0xff]   ;;  %v975_v45 = vld [vmem:[%s1277_s0 + $0xf4] ss:$8 sps:$4 sm:$0xff]   ;;  %v978_v47 = vld [vmem:[%s1277_s0 + $0xf0] ss:$8 sps:$4 sm:$0xff]  }
  0x11   :  { %v1146_v51 = vld [vmem:[%s1278_s2] ss:$0 sm:$0xff] }
  0x13   :  { %796 = vmatpush3.bf16.msra.mxu0 %v924_v9  ;;  %911 = vmatpush3.bf16.msra.mxu1 %v924_v9 }
  0x14   :  { %797 = vmatprep.subr.bf16.mxu0 %v925_v10  ;;  %904 = vmatprep.subr.bf16.mxu1 %v925_v10 }
  0x17   :  { %798 = vmatpush3.bf16.msra.mxu0 %v926_v13  ;;  %912 = vmatpush3.bf16.msra.mxu1 %v926_v13 }
  0x18   :  { %799 = vmatprep.subr.bf16.mxu0 %v927_v14  ;;  %905 = vmatprep.subr.bf16.mxu1 %v927_v14 }
  0x1b   :  { %800 = vmatpush3.bf16.msra.mxu0 %v928_v15  ;;  %913 = vmatpush3.bf16.msra.mxu1 %v928_v15 }
  0x1c   :  { %801 = vmatprep.subr.bf16.mxu0 %v929_v16  ;;  %906 = vmatprep.subr.bf16.mxu1 %v929_v16 }
  0x1f   :  { %802 = vmatpush3.bf16.msra.mxu0 %v930_v17  ;;  %914 = vmatpush3.bf16.msra.mxu1 %v930_v17 }
  0x22   :  { %436 = vmatmul.mubr.bf16.vlgmr.msra.gmra.mrb[0].mxu0 %v931_v18  ;;  %500 = vmatmul.mubr.bf16.vlgmr.msra.gmra.mrb[0].mxu1 %v934_v19 }
  0x23   :  { %443 = vmatprep.mubr.bf16.mxu0 %v937_v20  ;;  %507 = vmatprep.mubr.bf16.mxu1 %v939_v21 }
  0x2a   :  { %444 = vmatmul.mubr.bf16.gmra.mrb[4].mxu0 %v941_v22  ;;  %508 = vmatmul.mubr.bf16.gmra.mrb[4].mxu1 %v942_v23 }
  0x2b   :  { %451 = vmatprep.mubr.bf16.mxu0 %v943_v24  ;;  %515 = vmatprep.mubr.bf16.mxu1 %v945_v25 }
  0x32   :  { %452 = vmatmul.mubr.bf16.gmra.mrb[8].mxu0 %v947_v26  ;;  %516 = vmatmul.mubr.bf16.gmra.mrb[8].mxu1 %v948_v27 }
  0x33   :  { %459 = vmatprep.mubr.bf16.mxu0 %v949_v28  ;;  %523 = vmatprep.mubr.bf16.mxu1 %v951_v29 }
  0x3a   :  { %460 = vmatmul.mubr.bf16.gmra.mrb[12].mxu0 %v953_v30  ;;  %524 = vmatmul.mubr.bf16.gmra.mrb[12].mxu1 %v954_v31 }
  0x3b   :  { %467 = vmatprep.mubr.bf16.mxu0 %v955_v32  ;;  %531 = vmatprep.mubr.bf16.mxu1 %v957_v33 }
  0x42   :  { %468 = vmatmul.mubr.bf16.gmra.mrb[16].mxu0 %v959_v34  ;;  %532 = vmatmul.mubr.bf16.gmra.mrb[16].mxu1 %v960_v35 }
  0x43   :  { %475 = vmatprep.mubr.bf16.mxu0 %v961_v36  ;;  %539 = vmatprep.mubr.bf16.mxu1 %v963_v37 }
  0x4a   :  { %476 = vmatmul.mubr.bf16.gmra.mrb[20].mxu0 %v965_v38  ;;  %540 = vmatmul.mubr.bf16.gmra.mrb[20].mxu1 %v966_v39 }
  0x4b   :  { %483 = vmatprep.mubr.bf16.mxu0 %v967_v40  ;;  %547 = vmatprep.mubr.bf16.mxu1 %v969_v41 }
  0x52   :  { %484 = vmatmul.mubr.bf16.gmra.mrb[24].mxu0 %v971_v42  ;;  %548 = vmatmul.mubr.bf16.gmra.mrb[24].mxu1 %v972_v43 }
  0x53   :  { %491 = vmatprep.mubr.bf16.mxu0 %v973_v44  ;;  %555 = vmatprep.mubr.bf16.mxu1 %v975_v45 }
  0x5a   :  { %492 = vmatmul.mubr.bf16.gmra.mrb[28].mxu0 %v977_v46  ;;  %556 = vmatmul.mubr.bf16.gmra.mrb[28].mxu1 %v978_v47 }
  0xf5   :  { %v803_v48 = vpop.f32.mrb[0].mxu0  ;;  %v851_v49 = vpop.f32.mrb[0].mxu1 }
  0xf6   :  { %v804_v50 = vpop.f32.mrb[1].mxu0  ;;  %v852_v52 = vpop.f32.mrb[1].mxu1 }
  0xf7   :  { %v805_v53 = vadd.f32 %v804_v50, %v803_v48  ;;  %v853_v54 = vadd.f32 %v852_v52, %v851_v49  ;;  %v806_v55 = vpop.f32.mrb[2].mxu0  ;;  %v854_v56 = vpop.f32.mrb[2].mxu1 }
  0xf8   :  { %v807_v57 = vpop.f32.mrb[3].mxu0  ;;  %v855_v58 = vpop.f32.mrb[3].mxu1 }
  0xf9   :  { %v670_v59 = vadd.f32 %v805_v53, %v1146_v51  ;;  %v686_v60 = vadd.f32 %v853_v54, %v1146_v51  ;;  %v808_v61 = vadd.f32 %v807_v57, %v806_v55  ;;  %v856_v62 = vadd.f32 %v855_v58, %v854_v56 }
  0xfb   :  { %702 = vst [vmem:[%s1279_s3] sm:$0xff] %v670_v59  ;;  %718 = vst [vmem:[%s1279_s3 + $0x80] sm:$0xff] %v686_v60  ;;  %v671_v63 = vadd.f32 %v808_v61, %v1146_v51  ;;  %v687_v0 = vadd.f32 %v856_v62, %v1146_v51 }
  0xfd   :  { %703 = vst [vmem:[%s1279_s3 + $0x8] sm:$0xff] %v671_v63  ;;  %719 = vst [vmem:[%s1279_s3 + $0x88] sm:$0xff] %v687_v0  ;;  %v809_v1 = vpop.f32.mrb[4].mxu0  ;;  %v857_v2 = vpop.f32.mrb[4].mxu1 }
  0xfe   :  { %v810_v3 = vpop.f32.mrb[5].mxu0  ;;  %v858_v4 = vpop.f32.mrb[5].mxu1 }
  0xff   :  { %v811_v5 = vadd.f32 %v810_v3, %v809_v1  ;;  %v859_v6 = vadd.f32 %v858_v4, %v857_v2  ;;  %v812_v7 = vpop.f32.mrb[6].mxu0  ;;  %v860_v8 = vpop.f32.mrb[6].mxu1 }
 0x100   :  { %v813_v9 = vpop.f32.mrb[7].mxu0  ;;  %v861_v10 = vpop.f32.mrb[7].mxu1 }
 0x101   :  { %v672_v11 = vadd.f32 %v811_v5, %v1146_v51  ;;  %v688_v12 = vadd.f32 %v859_v6, %v1146_v51  ;;  %v814_v13 = vadd.f32 %v813_v9, %v812_v7  ;;  %v862_v14 = vadd.f32 %v861_v10, %v860_v8 }
 0x103   :  { %704 = vst [vmem:[%s1279_s3 + $0x10] sm:$0xff] %v672_v11  ;;  %720 = vst [vmem:[%s1279_s3 + $0x90] sm:$0xff] %v688_v12  ;;  %v673_v15 = vadd.f32 %v814_v13, %v1146_v51  ;;  %v689_v16 = vadd.f32 %v862_v14, %v1146_v51 }
 0x105   :  { %705 = vst [vmem:[%s1279_s3 + $0x18] sm:$0xff] %v673_v15  ;;  %721 = vst [vmem:[%s1279_s3 + $0x98] sm:$0xff] %v689_v16  ;;  %v815_v17 = vpop.f32.mrb[8].mxu0  ;;  %v863_v18 = vpop.f32.mrb[8].mxu1 }
 0x106   :  { %v816_v19 = vpop.f32.mrb[9].mxu0  ;;  %v864_v20 = vpop.f32.mrb[9].mxu1 }
 0x107   :  { %v817_v21 = vadd.f32 %v816_v19, %v815_v17  ;;  %v865_v22 = vadd.f32 %v864_v20, %v863_v18  ;;  %v818_v23 = vpop.f32.mrb[10].mxu0  ;;  %v866_v24 = vpop.f32.mrb[10].mxu1 }
 0x108   :  { %v819_v25 = vpop.f32.mrb[11].mxu0  ;;  %v867_v26 = vpop.f32.mrb[11].mxu1 }
 0x109   :  { %v674_v27 = vadd.f32 %v817_v21, %v1146_v51  ;;  %v690_v28 = vadd.f32 %v865_v22, %v1146_v51  ;;  %v820_v29 = vadd.f32 %v819_v25, %v818_v23  ;;  %v868_v30 = vadd.f32 %v867_v26, %v866_v24 }
 0x10b   :  { %706 = vst [vmem:[%s1279_s3 + $0x20] sm:$0xff] %v674_v27  ;;  %722 = vst [vmem:[%s1279_s3 + $0xa0] sm:$0xff] %v690_v28  ;;  %v675_v31 = vadd.f32 %v820_v29, %v1146_v51  ;;  %v691_v32 = vadd.f32 %v868_v30, %v1146_v51 }
 0x10d   :  { %707 = vst [vmem:[%s1279_s3 + $0x28] sm:$0xff] %v675_v31  ;;  %723 = vst [vmem:[%s1279_s3 + $0xa8] sm:$0xff] %v691_v32  ;;  %v821_v33 = vpop.f32.mrb[12].mxu0  ;;  %v869_v34 = vpop.f32.mrb[12].mxu1 }
 0x10e   :  { %v822_v35 = vpop.f32.mrb[13].mxu0  ;;  %v870_v36 = vpop.f32.mrb[13].mxu1 }
 0x10f   :  { %v823_v37 = vadd.f32 %v822_v35, %v821_v33  ;;  %v871_v38 = vadd.f32 %v870_v36, %v869_v34  ;;  %v824_v39 = vpop.f32.mrb[14].mxu0  ;;  %v872_v40 = vpop.f32.mrb[14].mxu1 }
 0x110   :  { %v825_v41 = vpop.f32.mrb[15].mxu0  ;;  %v873_v42 = vpop.f32.mrb[15].mxu1 }
 0x111   :  { %v676_v43 = vadd.f32 %v823_v37, %v1146_v51  ;;  %v692_v44 = vadd.f32 %v871_v38, %v1146_v51  ;;  %v826_v45 = vadd.f32 %v825_v41, %v824_v39  ;;  %v874_v46 = vadd.f32 %v873_v42, %v872_v40 }
 0x113   :  { %708 = vst [vmem:[%s1279_s3 + $0x30] sm:$0xff] %v676_v43  ;;  %724 = vst [vmem:[%s1279_s3 + $0xb0] sm:$0xff] %v692_v44  ;;  %v677_v47 = vadd.f32 %v826_v45, %v1146_v51  ;;  %v693_v48 = vadd.f32 %v874_v46, %v1146_v51 }
 0x115   :  { %709 = vst [vmem:[%s1279_s3 + $0x38] sm:$0xff] %v677_v47  ;;  %725 = vst [vmem:[%s1279_s3 + $0xb8] sm:$0xff] %v693_v48  ;;  %v827_v49 = vpop.f32.mrb[16].mxu0  ;;  %v875_v50 = vpop.f32.mrb[16].mxu1 }
 0x116   :  { %v828_v52 = vpop.f32.mrb[17].mxu0  ;;  %v876_v53 = vpop.f32.mrb[17].mxu1 }
 0x117   :  { %v829_v54 = vadd.f32 %v828_v52, %v827_v49  ;;  %v877_v55 = vadd.f32 %v876_v53, %v875_v50  ;;  %v830_v56 = vpop.f32.mrb[18].mxu0  ;;  %v878_v57 = vpop.f32.mrb[18].mxu1 }
 0x118   :  { %v831_v58 = vpop.f32.mrb[19].mxu0  ;;  %v879_v59 = vpop.f32.mrb[19].mxu1 }
 0x119   :  { %v678_v60 = vadd.f32 %v829_v54, %v1146_v51  ;;  %v694_v61 = vadd.f32 %v877_v55, %v1146_v51  ;;  %v832_v62 = vadd.f32 %v831_v58, %v830_v56  ;;  %v880_v63 = vadd.f32 %v879_v59, %v878_v57 }
 0x11b   :  { %710 = vst [vmem:[%s1279_s3 + $0x40] sm:$0xff] %v678_v60  ;;  %726 = vst [vmem:[%s1279_s3 + $0xc0] sm:$0xff] %v694_v61  ;;  %v679_v0 = vadd.f32 %v832_v62, %v1146_v51  ;;  %v695_v1 = vadd.f32 %v880_v63, %v1146_v51 }
 0x11d   :  { %711 = vst [vmem:[%s1279_s3 + $0x48] sm:$0xff] %v679_v0  ;;  %727 = vst [vmem:[%s1279_s3 + $0xc8] sm:$0xff] %v695_v1  ;;  %v833_v2 = vpop.f32.mrb[20].mxu0  ;;  %v881_v3 = vpop.f32.mrb[20].mxu1 }
 0x11e   :  { %v834_v4 = vpop.f32.mrb[21].mxu0  ;;  %v882_v5 = vpop.f32.mrb[21].mxu1 }
 0x11f   :  { %v835_v6 = vadd.f32 %v834_v4, %v833_v2  ;;  %v883_v7 = vadd.f32 %v882_v5, %v881_v3  ;;  %v836_v8 = vpop.f32.mrb[22].mxu0  ;;  %v884_v9 = vpop.f32.mrb[22].mxu1 }
 0x120   :  { %v837_v10 = vpop.f32.mrb[23].mxu0  ;;  %v885_v11 = vpop.f32.mrb[23].mxu1 }
 0x121   :  { %v680_v12 = vadd.f32 %v835_v6, %v1146_v51  ;;  %v696_v13 = vadd.f32 %v883_v7, %v1146_v51  ;;  %v838_v14 = vadd.f32 %v837_v10, %v836_v8  ;;  %v886_v15 = vadd.f32 %v885_v11, %v884_v9 }
 0x123   :  { %712 = vst [vmem:[%s1279_s3 + $0x50] sm:$0xff] %v680_v12  ;;  %728 = vst [vmem:[%s1279_s3 + $0xd0] sm:$0xff] %v696_v13  ;;  %v681_v16 = vadd.f32 %v838_v14, %v1146_v51  ;;  %v697_v17 = vadd.f32 %v886_v15, %v1146_v51 }
 0x125   :  { %713 = vst [vmem:[%s1279_s3 + $0x58] sm:$0xff] %v681_v16  ;;  %729 = vst [vmem:[%s1279_s3 + $0xd8] sm:$0xff] %v697_v17  ;;  %v839_v18 = vpop.f32.mrb[24].mxu0  ;;  %v887_v19 = vpop.f32.mrb[24].mxu1 }
 0x126   :  { %v840_v20 = vpop.f32.mrb[25].mxu0  ;;  %v888_v21 = vpop.f32.mrb[25].mxu1 }
 0x127   :  { %v841_v22 = vadd.f32 %v840_v20, %v839_v18  ;;  %v889_v23 = vadd.f32 %v888_v21, %v887_v19  ;;  %v842_v24 = vpop.f32.mrb[26].mxu0  ;;  %v890_v25 = vpop.f32.mrb[26].mxu1 }
 0x128   :  { %v843_v26 = vpop.f32.mrb[27].mxu0  ;;  %v891_v27 = vpop.f32.mrb[27].mxu1 }
 0x129   :  { %v682_v28 = vadd.f32 %v841_v22, %v1146_v51  ;;  %v698_v29 = vadd.f32 %v889_v23, %v1146_v51  ;;  %v844_v30 = vadd.f32 %v843_v26, %v842_v24  ;;  %v892_v31 = vadd.f32 %v891_v27, %v890_v25 }
 0x12b   :  { %714 = vst [vmem:[%s1279_s3 + $0x60] sm:$0xff] %v682_v28  ;;  %730 = vst [vmem:[%s1279_s3 + $0xe0] sm:$0xff] %v698_v29  ;;  %v683_v32 = vadd.f32 %v844_v30, %v1146_v51  ;;  %v699_v33 = vadd.f32 %v892_v31, %v1146_v51 }
 0x12d   :  { %715 = vst [vmem:[%s1279_s3 + $0x68] sm:$0xff] %v683_v32  ;;  %731 = vst [vmem:[%s1279_s3 + $0xe8] sm:$0xff] %v699_v33  ;;  %v845_v34 = vpop.f32.mrb[28].mxu0  ;;  %v893_v35 = vpop.f32.mrb[28].mxu1 }
 0x12e   :  { %v846_v36 = vpop.f32.mrb[29].mxu0  ;;  %v894_v37 = vpop.f32.mrb[29].mxu1 }
 0x12f   :  { %v847_v38 = vadd.f32 %v846_v36, %v845_v34  ;;  %v895_v39 = vadd.f32 %v894_v37, %v893_v35  ;;  %v848_v40 = vpop.f32.mrb[30].mxu0  ;;  %v896_v41 = vpop.f32.mrb[30].mxu1 }
 0x130   :  { %v849_v42 = vpop.f32.mrb[31].mxu0  ;;  %v897_v43 = vpop.f32.mrb[31].mxu1 }
 0x131   :  { %v684_v44 = vadd.f32 %v847_v38, %v1146_v51  ;;  %v700_v45 = vadd.f32 %v895_v39, %v1146_v51  ;;  %v850_v46 = vadd.f32 %v849_v42, %v848_v40  ;;  %v898_v47 = vadd.f32 %v897_v43, %v896_v41 }
 0x133   :  { %716 = vst [vmem:[%s1279_s3 + $0x70] sm:$0xff] %v684_v44  ;;  %732 = vst [vmem:[%s1279_s3 + $0xf0] sm:$0xff] %v700_v45  ;;  %v685_v48 = vadd.f32 %v850_v46, %v1146_v51  ;;  %v701_v49 = vadd.f32 %v898_v47, %v1146_v51 }
 0x135   :  { %717 = vst [vmem:[%s1279_s3 + $0x78] sm:$0xff] %v685_v48  ;;  %733 = vst [vmem:[%s1279_s3 + $0xf8] sm:$0xff] %v701_v49 }

// kernel: pix2pix_forward.8
= control target key start
LH: loop header
LB: loop body
LE: loop exit
PB: predicated region body
PF: predicated region fallthrough
CT: control target
= control target key end

     0   :  { %s141_s0 = inlined_call_operand.vmem [shape: f32[8,128], index: 0, kind: input, shape index: {}]   ;;  %s142_s1 = inlined_call_operand.hbm [shape: f32[1,1], index: 1, kind: output, shape index: {}]  }
   0x1   :  { %v15_v0 = vld [vmem:[%s141_s0] sm:$0xff] }
   0x2   :  { %6 = vsyncpa [#allocation3], 0  ;;  %v28_v1 = vand.u32 2147483647, %v15_v0  ;;  %v16_v5 = vlaneseq  ;;  %v25_v12 = vmax.f32 %v15_v0, 0.0  ;;  %v26_v13 = vmul.f32 0.0, %v15_v0 }
   0x3   :  { %vm13_vm2 = vcmask 0   ;;  %v111_v23 = vmov 0.0   ;;  %s112_s8 = smov [#allocation2]  }
   0x4   :  { %v29_v2 = vsub.f32 0.0, %v28_v1  ;;  %v17_v7 = vshrl.u32 %v16_v5, 7  ;;  %v19_v9 = vand.u32 127, %v16_v5  ;;  %v27_v18 = vsub.f32 %v25_v12, %v26_v13  ;;  %14 = vst.msk [vmem:[#allocation2] sm:$0x1] %vm13_vm2, %v111_v23  ;;  %s71_s9 = sshll.u32 %s112_s8, 4  ;;  %s72_s9 = int_to_ptr.vmem [resolvable:$true] %s71_s9 }
   0x5   :  { %s87_s10 = scalar_lea.vmem %s72_s9, 16  ;;  %s91_s11 = scalar_lea.vmem %s72_s9, 32 }
   0x6   :  { %v30_v3 = vmul.f32 1.442695, %v29_v2  ;;  %v23_v10 = vmul.u32 128, %v17_v7  ;;  %p88_p0 = scmp.ne.s32.totalorder %s72_s9, %s87_s10  ;;  %p92_p1 = scmp.lt.s32.totalorder %s72_s9, %s72_s9 }
   0x7   :  { %p93_p2 = scmp.lt.s32.totalorder %s91_s11, %s87_s10 }
   0x8   :  { %83 = vpow2.f32 %v30_v3  ;;  %v24_v15 = vadd.s32 %v23_v10, %v19_v9 }
   0x9   :  { %p94_p3 = por %p93_p2, %p92_p1 }
   0xa   :  { %vm42_vm1 = vcmp.lt.s32.totalorder %v24_v15, 18 }
   0xb   :  { %v44_v31 = vld [vmem:[#allocation2] sm:$0x1]  ;;  %p95_p4 = pnand %p94_p3, %p88_p0 }
  0x12   :  { %v84_v4 = vpop.eup %83 }
  0x13   :  { %v32_v6 = vadd.f32 1.0, %v84_v4  ;;  %v35_v8 = vmul.f32 -0.5, %v84_v4  ;;  %v38_v14 = vand.u32 2147483647, %v84_v4 }
  0x15   :  { %85 = vlog2.f32 %v32_v6  ;;  %v36_v11 = vadd.f32 1.0, %v35_v8  ;;  %vm39_vm0 = vcmp.lt.f32.partialorder %v38_v14, 0.0004427343 }
  0x17   :  { %v37_v16 = vmul.f32 %v84_v4, %v36_v11 }
  0x1f   :  { %v86_v17 = vpop.eup %85 }
  0x20   :  { %v34_v19 = vmul.f32 0.6931472, %v86_v17 }
  0x22   :  { %v40_v20 = vsel %vm39_vm0, %v37_v16, %v34_v19 }
  0x23   :  { %v41_v21 = vadd.f32 %v40_v20, %v27_v18 }
  0x25   :  { %v43_v22 = vsel %vm42_vm1, %v41_v21, 0.0 }
  0x26   :  { %45 = vadd.xlane.f32.xlu0 %v43_v22 }
  0xb3   :  { %v46_v24 = vpop.xlane.xlu0 %45 }
  0xb4   :  { %v47_v25 = vrot.slane %v46_v24, 4 }
  0xb6   :  { %v48_v26 = vadd.f32 %v47_v25, %v46_v24 }
  0xb8   :  { %v49_v27 = vrot.slane %v48_v26, 2 }
  0xba   :  { %v50_v28 = vadd.f32 %v49_v27, %v48_v26 }
  0xbc   :  { %v51_v29 = vrot.slane %v50_v28, 1 }
  0xbe   :  { %v52_v30 = vadd.f32 %v51_v29, %v50_v28 }
  0xc0   :  { %79 = vpush %v52_v30 }
  0xf1   :  { %s80_s0 = spop %79 }
  0xf2   :  { %v54_v32 = vstv %s80_s0 }
  0xf3   :  { %v55_v33 = vadd.f32 %v54_v32, %v44_v31 }
  0xf5   :  { %57 = vst.msk [vmem:[#allocation2] sm:$0x1] %vm13_vm2, %v55_v33 }
  0xfc   :  { %v61_v34 = vld [vmem:[#allocation2] sm:$0x1] }
  0xfd   :  { %v63_v35 = vmul.f32 0.055555556, %v61_v34 }
  0xff   :  { %64 = vst.msk [vmem:[#allocation2] sm:$0x1] %vm13_vm2, %v63_v35 }
 0x100   :  { %98 = shalt.err (!%p95_p4)
}
 0x101   :  { %s99_s14 = scalar_lea.hbm %s142_s1, 16 }
 0x102   :  { %p100_p5 = scmp.ne.s32.totalorder %s142_s1, %s99_s14  ;;  %p103_p6 = scmp.lt.u32.totalorder %s99_s14, %s142_s1 }
 0x104   :  { %p105_p7 = pnand %p103_p6, %p100_p5 }
 0x106   :  { %108 = shalt.err (!%p105_p7)
}
 0x107   :  { %74 = dma.vmem_to_hbm [thread:$0]  %s72_s9, 16, %s142_s1, [#allocation3]  }
 0x108   :  { %109 = dma.done.wait [#allocation3], 16  }
 0x109   :  { %110 = vsyncadd [#allocation3], 4294967280 }
 0x10a   :  { %78 = vsyncpa [#allocation3], 1 }

</bundles_post_ra>
